<compile_context>
chip_gen: v7x
topology: tpu7x:2x2x1
jax: 0.10.0
libtpu: 0.0.40
codegen_flags: <defaults>
</compile_context>

<pallas_src>
import functools

import jax
import jax.numpy as jnp
from jax.experimental import pallas as pl
from jax.experimental.pallas import tpu as pltpu

LANES = 128
SUBLANES = 8


def _round_up(x, m):
    return (x + m - 1) // m * m


# ------------------------------ fused kernel --------------------------------

def _cgcnn_fused_kernel(*refs, num_pre, num_post, c_real):
    """CGCNN forward; grid = (conv_layer, edge_tile), h / agg VMEM-resident."""
    it = iter(refs)
    x_ref = next(it)          # (Np, CP) f32   padded node features
    ea_ref = next(it)         # (TE, CP) f32   edge attrs, pre-placed at lanes [2C, 2C+F)
    src_ref = next(it)        # (TE, 1)  i32   edge source (x_j), -1 = pad
    dst_ref = next(it)        # (TE, 1)  i32   edge target (x_i), -1 = pad
    dstr_ref = next(it)       # (1, TE)  i32   edge target, row layout (scatter)
    batch_ref = next(it)      # (1, Np)  i32   node -> graph id, -1 = pad
    pre = [(next(it), next(it)) for _ in range(num_pre)]
    wconv_ref = next(it)      # (CP, 2*CP) bf16  fused [Wf | Ws] for layer l
    bconv_ref = next(it)      # (1, 2*CP)  f32   fused [bf | bs] for layer l
    post = [(next(it), next(it)) for _ in range(num_post)]
    wout_ref = next(it)       # (CP, CP) bf16
    bout_ref = next(it)       # (1, CP)  f32
    o_ref = next(it)          # (Bp, CP) f32
    h_sc = next(it)           # (Np, CP) f32   node features (persists across grid)
    agg_sc = next(it)         # (Np, CP) f32   per-layer message accumulator

    f32, bf16 = jnp.float32, jnp.bfloat16
    n_nodes, cp = h_sc.shape
    te = ea_ref.shape[0]
    b_pad = o_ref.shape[0]

    l = pl.program_id(0)
    t = pl.program_id(1)
    n_l = pl.num_programs(0)
    n_t = pl.num_programs(1)

    # keep padded channels (>= c_real) exactly zero through the convs
    # (load-bearing: sigmoid(0)*softplus(0) ~= 0.347 leaks via the bias)
    col_mask = jax.lax.broadcasted_iota(jnp.int32, (1, cp), 1) < c_real

    # ---- pre-FC stack on the very first grid step ---------------------------
    @pl.when(jnp.logical_and(l == 0, t == 0))
    def _pre_fc():
        o_ref[...] = jnp.zeros_like(o_ref)
        h = x_ref[...]
        for w_ref, b_ref in pre:
            h = jnp.dot(h.astype(bf16), w_ref[...],
                        preferred_element_type=f32) + b_ref[...]
            h = jnp.maximum(h, 0.0)
        h_sc[...] = h

    @pl.when(t == 0)
    def _zero_agg():
        agg_sc[...] = jnp.zeros_like(agg_sc)

    # ---- CGConv messages for this edge tile ---------------------------------
    h_bf = h_sc[...].astype(bf16)
    iota_en = jax.lax.broadcasted_iota(jnp.int32, (te, n_nodes), 1)
    g_dst = (dst_ref[...] == iota_en).astype(bf16)     # (TE, N) gather x[dst]
    g_src = (src_ref[...] == iota_en).astype(bf16)     # (TE, N) gather x[src]
    x_i = jnp.dot(g_dst, h_bf, preferred_element_type=f32)   # (TE, CP)
    x_j = jnp.dot(g_src, h_bf, preferred_element_type=f32)   # (TE, CP)
    # 128-lane packed z: x_i at [0,C), x_j rolled to [C,2C), edge attrs at [2C,2C+F)
    z = x_i + pltpu.roll(x_j, c_real, 1) + ea_ref[...]
    gc = jnp.dot(z.astype(bf16), wconv_ref[...],
                 preferred_element_type=f32) + bconv_ref[...]       # (TE, 2*CP)
    gate = jax.nn.sigmoid(gc[:, :cp])
    core = jax.nn.softplus(gc[:, cp:])
    msgs = (gate * core).astype(bf16)                               # (TE, CP)
    iota_ne = jax.lax.broadcasted_iota(jnp.int32, (n_nodes, te), 0)
    scat = (dstr_ref[...] == iota_ne).astype(bf16)                  # (N, TE)
    agg_sc[...] += jnp.dot(scat, msgs, preferred_element_type=f32)  # scatter-add

    # ---- finish layer on the last edge tile ----------------------------------
    @pl.when(t == n_t - 1)
    def _finalize_layer():
        h_new = jnp.maximum(h_sc[...] + agg_sc[...], 0.0)   # residual + dropout(0) + relu
        h_new = jnp.where(col_mask, h_new, 0.0)
        h_sc[...] = h_new

        # ---- post-FC, global_mean_pool, lin_out after the last conv layer ----
        @pl.when(l == n_l - 1)
        def _readout():
            h = h_new
            for w_ref, b_ref in post:
                h = jnp.dot(h.astype(bf16), w_ref[...],
                            preferred_element_type=f32) + b_ref[...]
                h = jnp.maximum(h, 0.0)
            iota_bn = jax.lax.broadcasted_iota(jnp.int32, (b_pad, n_nodes), 0)
            pool = (batch_ref[...] == iota_bn).astype(f32)          # (Bp, N)
            counts = jnp.maximum(jnp.sum(pool, axis=-1, keepdims=True), 1.0)
            pooled = jnp.dot((pool / counts).astype(bf16), h.astype(bf16),
                             preferred_element_type=f32)            # (Bp, CP)
            o_ref[...] = jnp.dot(pooled.astype(bf16), wout_ref[...],
                                 preferred_element_type=f32) + bout_ref[...]


# ------------------------------ wrapper --------------------------------------

def cgcnn_forward(params, x, edge_index, edge_attr, batch, num_graphs, *, edge_tile=128):
    n, f = x.shape
    e, fe = edge_attr.shape
    cp = LANES
    c = params["c_real"]
    te = edge_tile
    n_pad = _round_up(n, LANES)                 # lane / K dim of gather one-hots
    e_pad = _round_up(e, te)
    b_pad = _round_up(max(num_graphs, 1), SUBLANES)
    num_convs = params["conv_w"].shape[0]

    x_p = jnp.zeros((n_pad, cp), jnp.float32).at[:n, :f].set(x.astype(jnp.float32))
    # edge attrs pre-placed at lane offset 2*C -> no in-kernel shift needed
    ea_p = jnp.zeros((e_pad, cp), jnp.float32).at[:e, 2 * c:2 * c + fe].set(
        edge_attr.astype(jnp.float32))
    src = edge_index[0].astype(jnp.int32)
    dst = edge_index[1].astype(jnp.int32)
    src_col = jnp.full((e_pad, 1), -1, jnp.int32).at[:e, 0].set(src)
    dst_col = jnp.full((e_pad, 1), -1, jnp.int32).at[:e, 0].set(dst)
    dst_row = jnp.full((1, e_pad), -1, jnp.int32).at[0, :e].set(dst)
    batch_row = jnp.full((1, n_pad), -1, jnp.int32).at[0, :n].set(batch.astype(jnp.int32))

    const2 = lambda l, t: (0, 0)
    flat_inputs = [x_p, ea_p, src_col, dst_col, dst_row, batch_row]
    in_specs = [
        pl.BlockSpec((n_pad, cp), const2),               # node features (resident)
        pl.BlockSpec((te, cp), lambda l, t: (t, 0)),     # edge attrs (streamed)
        pl.BlockSpec((te, 1), lambda l, t: (t, 0)),      # src (streamed)
        pl.BlockSpec((te, 1), lambda l, t: (t, 0)),      # dst (streamed)
        pl.BlockSpec((1, te), lambda l, t: (0, t)),      # dst row (streamed)
        pl.BlockSpec((1, n_pad), const2),                # batch ids (resident)
    ]
    for w, b in params["pre"]:
        flat_inputs += [w, b]
        in_specs += [pl.BlockSpec((cp, cp), const2), pl.BlockSpec((1, cp), const2)]
    flat_inputs += [params["conv_w"], params["conv_b"]]
    in_specs += [
        pl.BlockSpec((None, cp, 2 * cp), lambda l, t: (l, 0, 0)),   # layer-l weight
        pl.BlockSpec((None, 1, 2 * cp), lambda l, t: (l, 0, 0)),    # layer-l bias
    ]
    for w, b in params["post"]:
        flat_inputs += [w, b]
        in_specs += [pl.BlockSpec((cp, cp), const2), pl.BlockSpec((1, cp), const2)]
    wout, bout = params["lin_out"]
    flat_inputs += [wout, bout]
    in_specs += [pl.BlockSpec((cp, cp), const2), pl.BlockSpec((1, cp), const2)]

    kernel = functools.partial(
        _cgcnn_fused_kernel,
        num_pre=len(params["pre"]),
        num_post=len(params["post"]),
        c_real=c,
    )
    out = pl.pallas_call(
        kernel,
        out_shape=jax.ShapeDtypeStruct((b_pad, cp), jnp.float32),
        grid_spec=pltpu.PrefetchScalarGridSpec(
            num_scalar_prefetch=0,
            grid=(num_convs, e_pad // te),
            in_specs=in_specs,
            out_specs=pl.BlockSpec((b_pad, cp), const2),
            scratch_shapes=[pltpu.VMEM((n_pad, cp), jnp.float32),   # h
                            pltpu.VMEM((n_pad, cp), jnp.float32)],  # agg
        ),
        compiler_params=pltpu.CompilerParams(
            dimension_semantics=("arbitrary", "arbitrary"),
            vmem_limit_bytes=48 * 1024 * 1024,   # explicit ceiling; fits v7x 64 MiB
        ),
    )(*flat_inputs)
    return out[:num_graphs, 0]                    # lin_out(...).reshape(-1)


# ------------------------------ parameters -----------------------------------

def init_linear_params(key, in_dim, out_dim):
    k1, k2 = jax.random.split(key)
    bound = 1.0 / (in_dim ** 0.5)
    w = jax.random.uniform(k1, (in_dim, out_dim), jnp.float32, -bound, bound)
    b = jax.random.uniform(k2, (out_dim,), jnp.float32, -bound, bound)
    return w, b


def init_cgcnn_params(key, num_node_features, num_edge_features,
                      pre_out_channel, post_out_channel,
                      pre_fc_num, conv_num, post_fc_num, cp=LANES):
    """PyTorch-Linear-style init, packed into padded / lane-dense / bf16 layout."""
    keys = jax.random.split(key, pre_fc_num + 2 * conv_num + post_fc_num + 1)
    ki = iter(keys)

    def pad_linear(w, b):
        wp = jnp.zeros((cp, cp), jnp.float32).at[:w.shape[0], :w.shape[1]].set(w)
        bp = jnp.zeros((1, cp), jnp.float32).at[0, :b.shape[0]].set(b)
        return wp.astype(jnp.bfloat16), bp       # weights bf16 (MXU), bias f32

    pre = []
    for i in range(pre_fc_num):
        in_d = num_node_features if i == 0 else pre_out_channel
        pre.append(pad_linear(*init_linear_params(next(ki), in_d, pre_out_channel)))

    c, fe = pre_out_channel, num_edge_features
    z_dim = 2 * c + fe
    assert z_dim <= cp, "packed z slab requires 2*C + F <= 128"
    conv_w, conv_b = [], []
    for _ in range(conv_num):
        wf, bf_ = init_linear_params(next(ki), z_dim, c)
        ws, bs = init_linear_params(next(ki), z_dim, c)
        # z is a single 128-lane slab [x_i | x_j | e | 0...]; fuse Wf/Ws column-wise
        # so the kernel runs one (TE,128)@(128,256) matmul per edge tile.
        wfs = (jnp.zeros((cp, 2 * cp), jnp.float32)
               .at[:z_dim, 0:c].set(wf)
               .at[:z_dim, cp:cp + c].set(ws))
        bfs = (jnp.zeros((1, 2 * cp), jnp.float32)
               .at[0, 0:c].set(bf_)
               .at[0, cp:cp + c].set(bs))
        conv_w.append(wfs.astype(jnp.bfloat16))
        conv_b.append(bfs)

    post = []
    for i in range(post_fc_num):
        in_d = pre_out_channel if i == 0 else post_out_channel
        post.append(pad_linear(*init_linear_params(next(ki), in_d, post_out_channel)))

    lin_out = pad_linear(*init_linear_params(next(ki), post_out_channel, 1))

    return dict(pre=pre,
                conv_w=jnp.stack(conv_w),     # (L, 128, 256) bf16
                conv_b=jnp.stack(conv_b),     # (L, 1, 256)   f32
                post=post, lin_out=lin_out, c_real=pre_out_channel)


# ------------------------------ pure-JAX reference ----------------------------

def _cgcnn_reference(params, x, edge_index, edge_attr, batch, num_graphs):
    """Exact-gather f32 reference using the same (bf16-quantized) weights."""
    f32 = jnp.float32
    cp = LANES
    c = params["c_real"]
    fe = edge_attr.shape[1]
    n = x.shape[0]
    h = jnp.zeros((n, cp), f32).at[:, :x.shape[1]].set(x.astype(f32))
    for w, b in params["pre"]:
        h = jnp.maximum(h @ w.astype(f32) + b, 0.0)
    src, dst = edge_index[0], edge_index[1]
    ea = jnp.zeros((src.shape[0], cp), f32).at[:, 2 * c:2 * c + fe].set(edge_attr.astype(f32))
    col_mask = jnp.arange(cp) < c
    for li in range(params["conv_w"].shape[0]):
        w = params["conv_w"][li].astype(f32)
        b = params["conv_b"][li]
        z = h[dst] + jnp.roll(h[src], c, axis=-1) + ea
        gc = z @ w + b[0]
        msgs = jax.nn.sigmoid(gc[:, :cp]) * jax.nn.softplus(gc[:, cp:])
        agg = jnp.zeros_like(h).at[dst].add(msgs)
        h = jnp.where(col_mask, jnp.maximum(h + agg, 0.0), 0.0)
    for w, b in params["post"]:
        h = jnp.maximum(h @ w.astype(f32) + b, 0.0)
    pool = (batch[None, :] == jnp.arange(num_graphs)[:, None]).astype(f32)
    counts = jnp.maximum(pool.sum(-1, keepdims=True), 1.0)
    pooled = (pool / counts) @ h
    wout, bout = params["lin_out"]
    return (pooled @ wout.astype(f32) + bout)[:, 0]


# ------------------------------ main ------------------------------------------

if __name__ == "__main__":
    key = jax.random.PRNGKey(0)

    # small synthetic graph batch (multi edge-tile, multi conv-layer grid)
    num_nodes = 100
    num_edges = 300
    num_node_features = 16
    num_edge_features = 8
    pre_out_channel = 32
    post_out_channel = 32
    pre_fc_num, conv_num, post_fc_num = 1, 2, 1
    num_graphs = 2

    k_x, k_e, k_src, k_dst, k_p = jax.random.split(key, 5)
    x = jax.random.normal(k_x, (num_nodes, num_node_features), jnp.float32)
    edge_attr = jax.random.normal(k_e, (num_edges, num_edge_features), jnp.float32)
    src = jax.random.randint(k_src, (num_edges,), 0, num_nodes, jnp.int32)
    dst = jax.random.randint(k_dst, (num_edges,), 0, num_nodes, jnp.int32)
    edge_index = jnp.stack([src, dst], axis=0)                                    # (2, E)
    batch = jnp.concatenate([jnp.zeros(50, jnp.int32), jnp.ones(50, jnp.int32)])  # node -> graph

    params = init_cgcnn_params(k_p, num_node_features, num_edge_features,
                               pre_out_channel, post_out_channel,
                               pre_fc_num, conv_num, post_fc_num)

    out = cgcnn_forward(params, x, edge_index, edge_attr, batch, num_graphs)
    out = jax.block_until_ready(out)
    ref = _cgcnn_reference(params, x, edge_index, edge_attr, batch, num_graphs)

    assert out.shape == (num_graphs,)
    assert bool(jnp.all(jnp.isfinite(out)))
    assert bool(jnp.allclose(out, ref, atol=5e-2, rtol=5e-2)), (out, ref)
    print("KERNEL_OK")
</pallas_src>

<mosaic_0001>
module attributes {stable_mosaic.version = 11 : i64} {
  func.func @_cgcnn_fused_kernel(%arg0: i32, %arg1: i32, %arg2: memref<128x128xf32, #tpu.memory_space<vmem>>, %arg3: memref<128x128xf32, #tpu.memory_space<vmem>>, %arg4: memref<128x1xi32, #tpu.memory_space<vmem>>, %arg5: memref<128x1xi32, #tpu.memory_space<vmem>>, %arg6: memref<1x128xi32, #tpu.memory_space<vmem>>, %arg7: memref<1x128xi32, #tpu.memory_space<vmem>>, %arg8: memref<128x128xbf16, #tpu.memory_space<vmem>>, %arg9: memref<1x128xf32, #tpu.memory_space<vmem>>, %arg10: memref<1x128x256xbf16, #tpu.memory_space<vmem>>, %arg11: memref<1x1x256xf32, #tpu.memory_space<vmem>>, %arg12: memref<128x128xbf16, #tpu.memory_space<vmem>>, %arg13: memref<1x128xf32, #tpu.memory_space<vmem>>, %arg14: memref<128x128xbf16, #tpu.memory_space<vmem>>, %arg15: memref<1x128xf32, #tpu.memory_space<vmem>>, %arg16: memref<8x128xf32, #tpu.memory_space<vmem>>, %arg17: memref<128x128xf32, #tpu.memory_space<vmem>>, %arg18: memref<128x128xf32, #tpu.memory_space<vmem>>) attributes {dimension_semantics = [#tpu.dimension_semantics<arbitrary>, #tpu.dimension_semantics<arbitrary>], iteration_bounds = array<i64: 2, 3>, scalar_prefetch = 0 : i64, scratch_operands = 2 : i64, tpu.core_type = #tpu.core_type<tc>, window_params = [{pipeline_mode = #tpu.pipeline_mode<synchronous>, transform_indices = @transform_0, window_bounds = array<i64: 128, 128>}, {transform_indices = @transform_1, window_bounds = array<i64: 128, 128>}, {transform_indices = @transform_2, window_bounds = array<i64: 128, 1>}, {transform_indices = @transform_3, window_bounds = array<i64: 128, 1>}, {transform_indices = @transform_4, window_bounds = array<i64: 1, 128>}, {pipeline_mode = #tpu.pipeline_mode<synchronous>, transform_indices = @transform_5, window_bounds = array<i64: 1, 128>}, {pipeline_mode = #tpu.pipeline_mode<synchronous>, transform_indices = @transform_6, window_bounds = array<i64: 128, 128>}, {pipeline_mode = #tpu.pipeline_mode<synchronous>, transform_indices = @transform_7, window_bounds = array<i64: 1, 128>}, {transform_indices = @transform_8, window_bounds = array<i64: 1, 128, 256>}, {transform_indices = @transform_9, window_bounds = array<i64: 1, 1, 256>}, {pipeline_mode = #tpu.pipeline_mode<synchronous>, transform_indices = @transform_10, window_bounds = array<i64: 128, 128>}, {pipeline_mode = #tpu.pipeline_mode<synchronous>, transform_indices = @transform_11, window_bounds = array<i64: 1, 128>}, {pipeline_mode = #tpu.pipeline_mode<synchronous>, transform_indices = @transform_12, window_bounds = array<i64: 128, 128>}, {pipeline_mode = #tpu.pipeline_mode<synchronous>, transform_indices = @transform_13, window_bounds = array<i64: 1, 128>}, {pipeline_mode = #tpu.pipeline_mode<synchronous>, transform_indices = @transform_14, window_bounds = array<i64: 8, 128>}]} {
    %0 = tpu.iota {dimensions = array<i32: 1>} : vector<1x128xi32>
    %c32_i32 = arith.constant 32 : i32
    %1 = vector.broadcast %c32_i32 : i32 to vector<1x128xi32>
    %2 = arith.cmpi slt, %0, %1 : vector<1x128xi32>
    %c0_i32 = arith.constant 0 : i32
    %3 = arith.cmpi eq, %arg0, %c0_i32 : i32
    %c0_i32_0 = arith.constant 0 : i32
    %4 = arith.cmpi eq, %arg1, %c0_i32_0 : i32
    %5 = arith.andi %3, %4 : i1
    %6 = arith.extui %5 : i1 to i32
    %c0_i32_1 = arith.constant 0 : i32
    %7 = arith.cmpi ne, %6, %c0_i32_1 : i32
    scf.if %7 {
      %cst_31 = arith.constant 0.000000e+00 : f32
      %77 = vector.broadcast %cst_31 : f32 to vector<8x128xf32>
      %c0_32 = arith.constant 0 : index
      %c0_33 = arith.constant 0 : index
      %78 = vector.load %arg16[%c0_32, %c0_33] : memref<8x128xf32, #tpu.memory_space<vmem>>, vector<8x128xf32>
      tpu.vector_store %arg16[%c0_32, %c0_33], %77 {strides = array<i32>} : memref<8x128xf32, #tpu.memory_space<vmem>>, vector<8x128xf32>,
      %c0_34 = arith.constant 0 : index
      %c0_35 = arith.constant 0 : index
      %79 = vector.load %arg2[%c0_34, %c0_35] : memref<128x128xf32, #tpu.memory_space<vmem>>, vector<128x128xf32>
      %80 = arith.truncf %79 : vector<128x128xf32> to vector<128x128xbf16>
      %c0_36 = arith.constant 0 : index
      %c0_37 = arith.constant 0 : index
      %81 = vector.load %arg8[%c0_36, %c0_37] : memref<128x128xbf16, #tpu.memory_space<vmem>>, vector<128x128xbf16>
      %cst_38 = arith.constant dense<0.000000e+00> : vector<128x128xf32>
      %82 = tpu.matmul %80, %81, %cst_38 {dimension_numbers = #tpu.dot_dimension_numbers<[1], [0], [0], [1], [0, 0, 1, 1], [], []>} : vector<128x128xbf16>, vector<128x128xbf16>, vector<128x128xf32> -> vector<128x128xf32>
      %c0_39 = arith.constant 0 : index
      %c0_40 = arith.constant 0 : index
      %83 = vector.load %arg9[%c0_39, %c0_40] : memref<1x128xf32, #tpu.memory_space<vmem>>, vector<1x128xf32>
      %84 = vector.broadcast %83 : vector<1x128xf32> to vector<128x128xf32>
      %85 = arith.addf %82, %84 : vector<128x128xf32>
      %cst_41 = arith.constant 0.000000e+00 : f32
      %86 = vector.broadcast %cst_41 : f32 to vector<128x128xf32>
      %87 = arith.maximumf %85, %86 : vector<128x128xf32>
      %c0_42 = arith.constant 0 : index
      %c0_43 = arith.constant 0 : index
      %88 = vector.load %arg17[%c0_42, %c0_43] : memref<128x128xf32, #tpu.memory_space<vmem>>, vector<128x128xf32>
      tpu.vector_store %arg17[%c0_42, %c0_43], %87 {strides = array<i32>} : memref<128x128xf32, #tpu.memory_space<vmem>>, vector<128x128xf32>,
    } else {
    }
    %c0_i32_2 = arith.constant 0 : i32
    %8 = arith.cmpi eq, %arg1, %c0_i32_2 : i32
    %9 = arith.extui %8 : i1 to i32
    %c0_i32_3 = arith.constant 0 : i32
    %10 = arith.cmpi ne, %9, %c0_i32_3 : i32
    scf.if %10 {
      %cst_31 = arith.constant 0.000000e+00 : f32
      %77 = vector.broadcast %cst_31 : f32 to vector<128x128xf32>
      %c0_32 = arith.constant 0 : index
      %c0_33 = arith.constant 0 : index
      %78 = vector.load %arg18[%c0_32, %c0_33] : memref<128x128xf32, #tpu.memory_space<vmem>>, vector<128x128xf32>
      tpu.vector_store %arg18[%c0_32, %c0_33], %77 {strides = array<i32>} : memref<128x128xf32, #tpu.memory_space<vmem>>, vector<128x128xf32>,
    } else {
    }
    %c0 = arith.constant 0 : index
    %c0_4 = arith.constant 0 : index
    %11 = vector.load %arg17[%c0, %c0_4] : memref<128x128xf32, #tpu.memory_space<vmem>>, vector<128x128xf32>
    %12 = arith.truncf %11 : vector<128x128xf32> to vector<128x128xbf16>
    %13 = tpu.iota {dimensions = array<i32: 1>} : vector<128x128xi32>
    %c0_5 = arith.constant 0 : index
    %c0_6 = arith.constant 0 : index
    %14 = vector.load %arg5[%c0_5, %c0_6] : memref<128x1xi32, #tpu.memory_space<vmem>>, vector<128x1xi32>
    %15 = vector.broadcast %14 : vector<128x1xi32> to vector<128x128xi32>
    %16 = arith.cmpi eq, %15, %13 : vector<128x128xi32>
    %17 = arith.extui %16 : vector<128x128xi1> to vector<128x128xi32>
    %18 = arith.sitofp %17 : vector<128x128xi32> to vector<128x128xf32>
    %19 = arith.truncf %18 : vector<128x128xf32> to vector<128x128xbf16>
    %c0_7 = arith.constant 0 : index
    %c0_8 = arith.constant 0 : index
    %20 = vector.load %arg4[%c0_7, %c0_8] : memref<128x1xi32, #tpu.memory_space<vmem>>, vector<128x1xi32>
    %21 = vector.broadcast %20 : vector<128x1xi32> to vector<128x128xi32>
    %22 = arith.cmpi eq, %21, %13 : vector<128x128xi32>
    %23 = arith.extui %22 : vector<128x128xi1> to vector<128x128xi32>
    %24 = arith.sitofp %23 : vector<128x128xi32> to vector<128x128xf32>
    %25 = arith.truncf %24 : vector<128x128xf32> to vector<128x128xbf16>
    %cst = arith.constant dense<0.000000e+00> : vector<128x128xf32>
    %26 = tpu.matmul %19, %12, %cst {dimension_numbers = #tpu.dot_dimension_numbers<[1], [0], [0], [1], [0, 0, 1, 1], [], []>} : vector<128x128xbf16>, vector<128x128xbf16>, vector<128x128xf32> -> vector<128x128xf32>
    %cst_9 = arith.constant dense<0.000000e+00> : vector<128x128xf32>
    %27 = tpu.matmul %25, %12, %cst_9 {dimension_numbers = #tpu.dot_dimension_numbers<[1], [0], [0], [1], [0, 0, 1, 1], [], []>} : vector<128x128xbf16>, vector<128x128xbf16>, vector<128x128xf32> -> vector<128x128xf32>
    %c32_i32_10 = arith.constant 32 : i32
    %28 = tpu.dynamic_rotate %27 by %c32_i32_10 dim 1 : vector<128x128xf32>, i32 -> vector<128x128xf32>
    %29 = arith.addf %26, %28 : vector<128x128xf32>
    %c0_11 = arith.constant 0 : index
    %c0_12 = arith.constant 0 : index
    %30 = vector.load %arg3[%c0_11, %c0_12] : memref<128x128xf32, #tpu.memory_space<vmem>>, vector<128x128xf32>
    %31 = arith.addf %29, %30 : vector<128x128xf32>
    %32 = arith.truncf %31 : vector<128x128xf32> to vector<128x128xbf16>
    %c0_13 = arith.constant 0 : index
    %c0_14 = arith.constant 0 : index
    %c0_15 = arith.constant 0 : index
    %33 = vector.load %arg10[%c0_13, %c0_14, %c0_15] : memref<1x128x256xbf16, #tpu.memory_space<vmem>>, vector<1x128x256xbf16>
    %34 = vector.shape_cast %33 : vector<1x128x256xbf16> to vector<128x256xbf16>
    %cst_16 = arith.constant dense<0.000000e+00> : vector<128x256xf32>
    %35 = tpu.matmul %32, %34, %cst_16 {dimension_numbers = #tpu.dot_dimension_numbers<[1], [0], [0], [1], [0, 0, 1, 1], [], []>} : vector<128x128xbf16>, vector<128x256xbf16>, vector<128x256xf32> -> vector<128x256xf32>
    %c0_17 = arith.constant 0 : index
    %c0_18 = arith.constant 0 : index
    %c0_19 = arith.constant 0 : index
    %36 = vector.load %arg11[%c0_17, %c0_18, %c0_19] : memref<1x1x256xf32, #tpu.memory_space<vmem>>, vector<1x1x256xf32>
    %37 = vector.shape_cast %36 : vector<1x1x256xf32> to vector<1x256xf32>
    %38 = vector.broadcast %37 : vector<1x256xf32> to vector<128x256xf32>
    %39 = arith.addf %35, %38 : vector<128x256xf32>
    %40 = vector.extract_strided_slice %39 {offsets = [0, 0], sizes = [128, 128], strides = [1, 1]} : vector<128x256xf32> to vector<128x128xf32>
    %41 = arith.negf %40 : vector<128x128xf32>
    %42 = math.exp %41 : vector<128x128xf32>
    %cst_20 = arith.constant 1.000000e+00 : f32
    %43 = vector.broadcast %cst_20 : f32 to vector<128x128xf32>
    %44 = arith.addf %43, %42 : vector<128x128xf32>
    %45 = arith.divf %43, %44 : vector<128x128xf32>
    %46 = vector.extract_strided_slice %39 {offsets = [0, 128], sizes = [128, 128], strides = [1, 1]} : vector<128x256xf32> to vector<128x128xf32>
    %cst_21 = arith.constant 0.000000e+00 : f32
    %47 = vector.broadcast %cst_21 : f32 to vector<128x128xf32>
    %48 = arith.maximumf %46, %47 : vector<128x128xf32>
    %49 = vector.broadcast %cst_21 : f32 to vector<128x128xf32>
    %50 = arith.subf %46, %49 : vector<128x128xf32>
    %51 = arith.cmpf one, %50, %50 : vector<128x128xf32>
    %52 = vector.broadcast %cst_21 : f32 to vector<128x128xf32>
    %53 = arith.addf %46, %52 : vector<128x128xf32>
    %54 = math.absf %50 : vector<128x128xf32>
    %cst_22 = arith.constant 0.000000e+00 : f32
    %55 = vector.broadcast %cst_22 : f32 to vector<128x128xf32>
    %56 = arith.subf %55, %54 : vector<128x128xf32>
    %57 = math.exp %56 : vector<128x128xf32>
    %58 = math.log1p %57 : vector<128x128xf32>
    %59 = arith.addf %48, %58 : vector<128x128xf32>
    %60 = arith.select %51, %53, %59 : vector<128x128xi1>, vector<128x128xf32>
    %61 = arith.mulf %45, %60 : vector<128x128xf32>
    %62 = arith.truncf %61 : vector<128x128xf32> to vector<128x128xbf16>
    %63 = tpu.iota {dimensions = array<i32: 0>} : vector<128x128xi32>
    %c0_23 = arith.constant 0 : index
    %c0_24 = arith.constant 0 : index
    %64 = vector.load %arg6[%c0_23, %c0_24] : memref<1x128xi32, #tpu.memory_space<vmem>>, vector<1x128xi32>
    %65 = vector.broadcast %64 : vector<1x128xi32> to vector<128x128xi32>
    %66 = arith.cmpi eq, %65, %63 : vector<128x128xi32>
    %67 = arith.extui %66 : vector<128x128xi1> to vector<128x128xi32>
    %68 = arith.sitofp %67 : vector<128x128xi32> to vector<128x128xf32>
    %69 = arith.truncf %68 : vector<128x128xf32> to vector<128x128xbf16>
    %c0_25 = arith.constant 0 : index
    %c0_26 = arith.constant 0 : index
    %70 = vector.load %arg18[%c0_25, %c0_26] : memref<128x128xf32, #tpu.memory_space<vmem>>, vector<128x128xf32>
    %cst_27 = arith.constant dense<0.000000e+00> : vector<128x128xf32>
    %71 = tpu.matmul %69, %62, %cst_27 {dimension_numbers = #tpu.dot_dimension_numbers<[1], [0], [0], [1], [0, 0, 1, 1], [], []>} : vector<128x128xbf16>, vector<128x128xbf16>, vector<128x128xf32> -> vector<128x128xf32>
    %72 = arith.addf %70, %71 : vector<128x128xf32>
    %c0_28 = arith.constant 0 : index
    %c0_29 = arith.constant 0 : index
    %73 = vector.load %arg18[%c0_28, %c0_29] : memref<128x128xf32, #tpu.memory_space<vmem>>, vector<128x128xf32>
    tpu.vector_store %arg18[%c0_28, %c0_29], %72 {strides = array<i32>} : memref<128x128xf32, #tpu.memory_space<vmem>>, vector<128x128xf32>,
    %c2_i32 = arith.constant 2 : i32
    %74 = arith.cmpi eq, %arg1, %c2_i32 : i32
    %75 = arith.extui %74 : i1 to i32
    %c0_i32_30 = arith.constant 0 : i32
    %76 = arith.cmpi ne, %75, %c0_i32_30 : i32
    scf.if %76 {
      %c0_31 = arith.constant 0 : index
      %c0_32 = arith.constant 0 : index
      %77 = vector.load %arg17[%c0_31, %c0_32] : memref<128x128xf32, #tpu.memory_space<vmem>>, vector<128x128xf32>
      %c0_33 = arith.constant 0 : index
      %c0_34 = arith.constant 0 : index
      %78 = vector.load %arg18[%c0_33, %c0_34] : memref<128x128xf32, #tpu.memory_space<vmem>>, vector<128x128xf32>
      %79 = arith.addf %77, %78 : vector<128x128xf32>
      %cst_35 = arith.constant 0.000000e+00 : f32
      %80 = vector.broadcast %cst_35 : f32 to vector<128x128xf32>
      %81 = arith.maximumf %79, %80 : vector<128x128xf32>
      %cst_36 = arith.constant 0.000000e+00 : f32
      %82 = vector.shape_cast %2 : vector<1x128xi1> to vector<1x128xi1>
      %83 = vector.broadcast %82 : vector<1x128xi1> to vector<128x128xi1>
      %84 = vector.broadcast %cst_36 : f32 to vector<128x128xf32>
      %85 = arith.select %83, %81, %84 : vector<128x128xi1>, vector<128x128xf32>
      %c0_37 = arith.constant 0 : index
      %c0_38 = arith.constant 0 : index
      %86 = vector.load %arg17[%c0_37, %c0_38] : memref<128x128xf32, #tpu.memory_space<vmem>>, vector<128x128xf32>
      tpu.vector_store %arg17[%c0_37, %c0_38], %85 {strides = array<i32>} : memref<128x128xf32, #tpu.memory_space<vmem>>, vector<128x128xf32>,
      %c1_i32 = arith.constant 1 : i32
      %87 = arith.cmpi eq, %arg0, %c1_i32 : i32
      %88 = arith.extui %87 : i1 to i32
      %c0_i32_39 = arith.constant 0 : i32
      %89 = arith.cmpi ne, %88, %c0_i32_39 : i32
      scf.if %89 {
        %90 = arith.truncf %85 : vector<128x128xf32> to vector<128x128xbf16>
        %c0_40 = arith.constant 0 : index
        %c0_41 = arith.constant 0 : index
        %91 = vector.load %arg12[%c0_40, %c0_41] : memref<128x128xbf16, #tpu.memory_space<vmem>>, vector<128x128xbf16>
        %cst_42 = arith.constant dense<0.000000e+00> : vector<128x128xf32>
        %92 = tpu.matmul %90, %91, %cst_42 {dimension_numbers = #tpu.dot_dimension_numbers<[1], [0], [0], [1], [0, 0, 1, 1], [], []>} : vector<128x128xbf16>, vector<128x128xbf16>, vector<128x128xf32> -> vector<128x128xf32>
        %c0_43 = arith.constant 0 : index
        %c0_44 = arith.constant 0 : index
        %93 = vector.load %arg13[%c0_43, %c0_44] : memref<1x128xf32, #tpu.memory_space<vmem>>, vector<1x128xf32>
        %94 = vector.broadcast %93 : vector<1x128xf32> to vector<128x128xf32>
        %95 = arith.addf %92, %94 : vector<128x128xf32>
        %cst_45 = arith.constant 0.000000e+00 : f32
        %96 = vector.broadcast %cst_45 : f32 to vector<128x128xf32>
        %97 = arith.maximumf %95, %96 : vector<128x128xf32>
        %98 = tpu.iota {dimensions = array<i32: 0>} : vector<8x128xi32>
        %c0_46 = arith.constant 0 : index
        %c0_47 = arith.constant 0 : index
        %99 = vector.load %arg7[%c0_46, %c0_47] : memref<1x128xi32, #tpu.memory_space<vmem>>, vector<1x128xi32>
        %100 = vector.broadcast %99 : vector<1x128xi32> to vector<8x128xi32>
        %101 = arith.cmpi eq, %100, %98 : vector<8x128xi32>
        %102 = arith.extui %101 : vector<8x128xi1> to vector<8x128xi32>
        %103 = arith.sitofp %102 : vector<8x128xi32> to vector<8x128xf32>
        %cst_48 = arith.constant dense<0.000000e+00> : vector<8xf32>
        %104 = vector.multi_reduction <add>, %103, %cst_48 [1] : vector<8x128xf32> to vector<8xf32>
        %105 = vector.shape_cast %104 : vector<8xf32> to vector<8x1xf32>
        %cst_49 = arith.constant 1.000000e+00 : f32
        %106 = vector.broadcast %cst_49 : f32 to vector<8x1xf32>
        %107 = arith.maximumf %105, %106 : vector<8x1xf32>
        %108 = vector.broadcast %107 : vector<8x1xf32> to vector<8x128xf32>
        %109 = arith.divf %103, %108 : vector<8x128xf32>
        %110 = arith.truncf %109 : vector<8x128xf32> to vector<8x128xbf16>
        %111 = arith.truncf %97 : vector<128x128xf32> to vector<128x128xbf16>
        %cst_50 = arith.constant dense<0.000000e+00> : vector<8x128xf32>
        %112 = tpu.matmul %110, %111, %cst_50 {dimension_numbers = #tpu.dot_dimension_numbers<[1], [0], [0], [1], [0, 0, 1, 1], [], []>} : vector<8x128xbf16>, vector<128x128xbf16>, vector<8x128xf32> -> vector<8x128xf32>
        %113 = arith.truncf %112 : vector<8x128xf32> to vector<8x128xbf16>
        %c0_51 = arith.constant 0 : index
        %c0_52 = arith.constant 0 : index
        %114 = vector.load %arg14[%c0_51, %c0_52] : memref<128x128xbf16, #tpu.memory_space<vmem>>, vector<128x128xbf16>
        %cst_53 = arith.constant dense<0.000000e+00> : vector<8x128xf32>
        %115 = tpu.matmul %113, %114, %cst_53 {dimension_numbers = #tpu.dot_dimension_numbers<[1], [0], [0], [1], [0, 0, 1, 1], [], []>} : vector<8x128xbf16>, vector<128x128xbf16>, vector<8x128xf32> -> vector<8x128xf32>
        %c0_54 = arith.constant 0 : index
        %c0_55 = arith.constant 0 : index
        %116 = vector.load %arg15[%c0_54, %c0_55] : memref<1x128xf32, #tpu.memory_space<vmem>>, vector<1x128xf32>
        %117 = vector.broadcast %116 : vector<1x128xf32> to vector<8x128xf32>
        %118 = arith.addf %115, %117 : vector<8x128xf32>
        %c0_56 = arith.constant 0 : index
        %c0_57 = arith.constant 0 : index
        %119 = vector.load %arg16[%c0_56, %c0_57] : memref<8x128xf32, #tpu.memory_space<vmem>>, vector<8x128xf32>
        tpu.vector_store %arg16[%c0_56, %c0_57], %118 {strides = array<i32>} : memref<8x128xf32, #tpu.memory_space<vmem>>, vector<8x128xf32>,
      } else {
      }
    } else {
    }
    return
  }
  func.func @transform_0(%arg0: i32, %arg1: i32) -> (i32, i32) {
    %c0_i32 = arith.constant 0 : i32
    %c0_i32_0 = arith.constant 0 : i32
    %c0_i32_1 = arith.constant 0 : i32
    return %c0_i32, %c0_i32_0 : i32, i32
  }
  func.func @transform_1(%arg0: i32, %arg1: i32) -> (i32, i32) {
    %c0_i32 = arith.constant 0 : i32
    %c0_i32_0 = arith.constant 0 : i32
    return %arg1, %c0_i32 : i32, i32
  }
  func.func @transform_2(%arg0: i32, %arg1: i32) -> (i32, i32) {
    %c0_i32 = arith.constant 0 : i32
    %c0_i32_0 = arith.constant 0 : i32
    return %arg1, %c0_i32 : i32, i32
  }
  func.func @transform_3(%arg0: i32, %arg1: i32) -> (i32, i32) {
    %c0_i32 = arith.constant 0 : i32
    %c0_i32_0 = arith.constant 0 : i32
    return %arg1, %c0_i32 : i32, i32
  }
  func.func @transform_4(%arg0: i32, %arg1: i32) -> (i32, i32) {
    %c0_i32 = arith.constant 0 : i32
    %c0_i32_0 = arith.constant 0 : i32
    return %c0_i32, %arg1 : i32, i32
  }
  func.func @transform_5(%arg0: i32, %arg1: i32) -> (i32, i32) {
    %c0_i32 = arith.constant 0 : i32
    %c0_i32_0 = arith.constant 0 : i32
    %c0_i32_1 = arith.constant 0 : i32
    return %c0_i32, %c0_i32_0 : i32, i32
  }
  func.func @transform_6(%arg0: i32, %arg1: i32) -> (i32, i32) {
    %c0_i32 = arith.constant 0 : i32
    %c0_i32_0 = arith.constant 0 : i32
    %c0_i32_1 = arith.constant 0 : i32
    return %c0_i32, %c0_i32_0 : i32, i32
  }
  func.func @transform_7(%arg0: i32, %arg1: i32) -> (i32, i32) {
    %c0_i32 = arith.constant 0 : i32
    %c0_i32_0 = arith.constant 0 : i32
    %c0_i32_1 = arith.constant 0 : i32
    return %c0_i32, %c0_i32_0 : i32, i32
  }
  func.func @transform_8(%arg0: i32, %arg1: i32) -> (i32, i32, i32) {
    %c0_i32 = arith.constant 0 : i32
    %c0_i32_0 = arith.constant 0 : i32
    %c0_i32_1 = arith.constant 0 : i32
    return %arg0, %c0_i32, %c0_i32_0 : i32, i32, i32
  }
  func.func @transform_9(%arg0: i32, %arg1: i32) -> (i32, i32, i32) {
    %c0_i32 = arith.constant 0 : i32
    %c0_i32_0 = arith.constant 0 : i32
    %c0_i32_1 = arith.constant 0 : i32
    return %arg0, %c0_i32, %c0_i32_0 : i32, i32, i32
  }
  func.func @transform_10(%arg0: i32, %arg1: i32) -> (i32, i32) {
    %c0_i32 = arith.constant 0 : i32
    %c0_i32_0 = arith.constant 0 : i32
    %c0_i32_1 = arith.constant 0 : i32
    return %c0_i32, %c0_i32_0 : i32, i32
  }
  func.func @transform_11(%arg0: i32, %arg1: i32) -> (i32, i32) {
    %c0_i32 = arith.constant 0 : i32
    %c0_i32_0 = arith.constant 0 : i32
    %c0_i32_1 = arith.constant 0 : i32
    return %c0_i32, %c0_i32_0 : i32, i32
  }
  func.func @transform_12(%arg0: i32, %arg1: i32) -> (i32, i32) {
    %c0_i32 = arith.constant 0 : i32
    %c0_i32_0 = arith.constant 0 : i32
    %c0_i32_1 = arith.constant 0 : i32
    return %c0_i32, %c0_i32_0 : i32, i32
  }
  func.func @transform_13(%arg0: i32, %arg1: i32) -> (i32, i32) {
    %c0_i32 = arith.constant 0 : i32
    %c0_i32_0 = arith.constant 0 : i32
    %c0_i32_1 = arith.constant 0 : i32
    return %c0_i32, %c0_i32_0 : i32, i32
  }
  func.func @transform_14(%arg0: i32, %arg1: i32) -> (i32, i32) {
    %c0_i32 = arith.constant 0 : i32
    %c0_i32_0 = arith.constant 0 : i32
    %c0_i32_1 = arith.constant 0 : i32
    return %c0_i32, %c0_i32_0 : i32, i32
  }
}

</mosaic_0001>

<bundles_post_ra>
// kernel: tpu_custom_call.1
= control target key start
LH: loop header
LB: loop body
LE: loop exit
PB: predicated region body
PF: predicated region fallthrough
CT: control target
= control target key end

     0   :  { %s5006_s0 = inlined_call_operand.vmem [shape: f32[128,128], index: 0, kind: input, shape index: {}]   ;;  %s5007_s1 = inlined_call_operand.vmem [shape: f32[384,128], index: 1, kind: input, shape index: {}]   ;;  %s5008_s2 = inlined_call_operand.vmem [shape: s32[384,1], index: 2, kind: input, shape index: {}]   ;;  %s5009_s3 = inlined_call_operand.vmem [shape: s32[384,1], index: 3, kind: input, shape index: {}]   ;;  %s5010_s4 = inlined_call_operand.vmem [shape: s32[1,384], index: 4, kind: input, shape index: {}]   ;;  %s5011_s5 = inlined_call_operand.vmem [shape: s32[1,128], index: 5, kind: input, shape index: {}]   ;;  %s5012_s6 = inlined_call_operand.hbm [shape: bf16[128,128], index: 6, kind: input, shape index: {}]   ;;  %s5013_s7 = inlined_call_operand.vmem [shape: f32[1,128], index: 7, kind: input, shape index: {}]   ;;  %s5014_s8 = inlined_call_operand.vmem [shape: bf16[2,128,256], index: 8, kind: input, shape index: {}]   ;;  %s5015_s9 = inlined_call_operand.vmem [shape: f32[2,1,256], index: 9, kind: input, shape index: {}]   ;;  %s5016_s10 = inlined_call_operand.hbm [shape: bf16[128,128], index: 10, kind: input, shape index: {}]   ;;  %s5017_s11 = inlined_call_operand.vmem [shape: f32[1,128], index: 11, kind: input, shape index: {}]   ;;  %s5018_s12 = inlined_call_operand.hbm [shape: bf16[128,128], index: 12, kind: input, shape index: {}]   ;;  %s5019_s13 = inlined_call_operand.vmem [shape: f32[1,128], index: 13, kind: input, shape index: {}]   ;;  %s5020_s14 = inlined_call_operand.hbm [shape: f32[8,128], index: 14, kind: output, shape index: {}]  }
   0x1   :  { %5029 = sst [smem:[#allocation16_spill]] %s5011_s5 }
   0x2   :  { %5030 = sst [smem:[#allocation17_spill]] %s5013_s7 }
   0x3   :  { %5031 = sst [smem:[#allocation18_spill]] %s5016_s10 }
   0x4   :  { %5032 = sst [smem:[#allocation19_spill]] %s5017_s11 }
   0x5   :  { %5033 = sst [smem:[#allocation20_spill]] %s5019_s13 }
   0x6   :  { %5034 = sst [smem:[#allocation21_spill]] %s5020_s14 }
   0x7   :  { %19 = vsyncpa [#allocation5], 0 }
   0x8   :  { %20 = vsyncpa [#allocation8], 0 }
   0x9   :  { %21 = vsyncpa [#allocation6], 0  ;;  %s3903_s29 = smov 0   ;;  %s3905_s30 = smov 0  }
   0xa   :  { %s3907_s15 = smov 0   ;;  %s3909_s16 = smov 0  }
   0xb   :  { %s3911_s17 = smov 0  }
   0xc LB: > { %5035 = sst [smem:[#allocation14_spill]] %s3813_s17  ;;  %s5021_s18 = sadd.s32 4294967295, %s3813_s17   ;;  %s3813_s17 = sphi %s3911_s17, %s27_s17   ;;  %s3809_s16 = sphi %s3909_s16, %s5083_s16   ;;  %s3805_s15 = sphi %s3907_s15, %s5082_s15   ;;  %s3801_s30 = sphi %s3905_s30, %s5081_s30   ;;  %s3797_s29 = sphi %s3903_s29, %s5080_s29  }
   0xd   : > { %p2863_p0 = scmp.ge.s32.totalorder %s3813_s17, 1  ;;  %p389_p1 = scmp.lt.s32.totalorder %s3813_s17, 7 }
   0xe   : > { %p3933_p2 = scmp.eq.s32.totalorder %s5021_s18, 0  ;;  %s3815_s21 = smov [#allocation7]  }
   0xf   : > { %p3937_p3 = pnand %p2863_p0, %p389_p1  ;;  %s423_s22 = sshll.u32 %s3815_s21, 4  ;;  %s424_s22 = int_to_ptr.vmem [resolvable:$true] %s423_s22 }
  0x10   : > { %s5036_s19 = scalar_select %p3933_p2, 1, 0 }
  0x11   : > { %s5037_s20 = scalar_select %p3937_p3, 1, 0 }
  0x12   : > { %p3401_p4 = pneg %p3937_p3  ;;  %s5039_s10 = sld [smem:[#allocation18_spill]] }
  0x14   : > { %p3945_p5 = pnand %p3933_p2, %p3401_p4 }
  0x16   : > { %p3957_p7 = pneg %p3945_p5 }
  0x18   : > { %s3653_s26 = scalar_lea.hbm %s5039_s10, 1024 }
  0x19   : > { %p3654_p6 = scmp.ne.s32.totalorder %s5039_s10, %s3653_s26  ;;  %p3660_p10 = scmp.lt.u32.totalorder %s3653_s26, %s5039_s10 }
  0x1b   : > { %p3656_p8 = pnand %p3957_p7, %p3654_p6 }
  0x1d   : > { %p3657_p9 = pneg %p3656_p8 }
  0x1f   : > { %p3662_p11 = pnand %p3660_p10, %p3657_p9 }
  0x21   : > { %3665 = shalt.err (!%p3662_p11)
}
  0x22   : > { %s3666_s24 = scalar_lea.vmem %s424_s22, 1024  ;;  %p3674_p1 = scmp.lt.s32.totalorder %s424_s22, %s424_s22 }
  0x23   : > { %p3667_p12 = scmp.ne.s32.totalorder %s424_s22, %s3666_s24  ;;  %p3675_p4 = scmp.lt.s32.totalorder %s3666_s24, %s3666_s24 }
  0x25   : > { %p3669_p13 = pnand %p3667_p12, %p3957_p7  ;;  %p3676_p2 = por %p3675_p4, %p3674_p1 }
  0x27   : > { %p3670_p0 = pneg %p3669_p13 }
  0x29   : > { %p3677_p3 = pnand %p3676_p2, %p3670_p0 }
  0x2b   : > { %3680 = shalt.err (!%p3677_p3)
}
  0x2c   : > { %s5027_s25 = smov 64   ;;  %s3817_s14 = smov 4  }
  0x2d   : > { %3407 = dma.hbm_to_vmem [thread:$0]  (!%p3945_p5), %s5039_s10, 1024, %s424_s22, [#allocation8], %s5027_s25, %s5027_s25, %s3817_s14  }
  0x2e   : > { %s36_s27 = sadd.s32 1, %s3805_s15  ;;  %s39_s28 = sadd.s32 1, %s3809_s16 }
  0x2f   : > { %p37_p6 = scmp.ge.s32.totalorder %s36_s27, 3  ;;  %s3818_s24 = smov [#allocation4]  }
  0x30   : > { %s407_s17 = sshll.u32 %s3818_s24, 4  ;;  %s3819_s13 = smov [#allocation9]   ;;  %s408_s17 = int_to_ptr.vmem [resolvable:$true] %s407_s17 }
  0x31   : > { %s5085_s27 = smov (%p37_p6, %s36_s27), 0  ;;  %s5087_s28 = smov (!%p37_p6, %s39_s28), %s3809_s16 }
  0x32   : > { %5041 = sst [smem:[#allocation15_spill]] %s5085_s27  ;;  %s439_s11 = sshll.u32 %s3819_s13, 4  ;;  %s3981_s11 = int_to_ptr.vmem [resolvable:$true] %s439_s11 }
  0x33   : > { %s3681_s18 = scalar_lea.hbm %s5012_s6, 1024 }
  0x34   : > { %p3682_p3 = scmp.ne.s32.totalorder %s5012_s6, %s3681_s18  ;;  %p3688_p10 = scmp.lt.u32.totalorder %s3681_s18, %s5012_s6 }
  0x36   : > { %p3684_p8 = pnand %p3682_p3, %p3957_p7 }
  0x38   : > { %p3685_p9 = pneg %p3684_p8 }
  0x3a   : > { %p3690_p11 = pnand %p3688_p10, %p3685_p9 }
  0x3c   : > { %3693 = shalt.err (!%p3690_p11)
}
  0x3d   : > { %s3694_s13 = scalar_lea.vmem %s408_s17, 1024  ;;  %p3702_p1 = scmp.lt.s32.totalorder %s408_s17, %s408_s17 }
  0x3e   : > { %p3695_p12 = scmp.ne.s32.totalorder %s408_s17, %s3694_s13  ;;  %p3703_p4 = scmp.lt.s32.totalorder %s3694_s13, %s3694_s13 }
  0x40   : > { %p3697_p13 = pnand %p3695_p12, %p3957_p7  ;;  %p3704_p6 = por %p3703_p4, %p3702_p1 }
  0x42   : > { %p3698_p0 = pneg %p3697_p13 }
  0x44   : > { %p3705_p2 = pnand %p3704_p6, %p3698_p0 }
  0x46   : > { %3708 = shalt.err (!%p3705_p2)
}
  0x47   : > { %s5042_s5 = smov 64   ;;  %p5043_p3 = scmp.ge.s32.totalorder %s5087_s28, 2 }
  0x48   : > { %3404 = dma.hbm_to_vmem [thread:$0]  (!%p3945_p5), %s5012_s6, 1024, %s408_s17, [#allocation5], %s5042_s5, %s5042_s5, %s3817_s14  }
  0x49   : > { %s5089_s28 = smov (%p5043_p3, %s5087_s28), 0  ;;  %s3709_s22 = scalar_lea.hbm %s5018_s12, 1024 }
  0x4a   : > { %p3710_p2 = scmp.ne.s32.totalorder %s5018_s12, %s3709_s22  ;;  %p3716_p10 = scmp.lt.u32.totalorder %s3709_s22, %s5018_s12 }
  0x4c   : > { %p3712_p8 = pnand %p3710_p2, %p3957_p7 }
  0x4e   : > { %p3713_p9 = pneg %p3712_p8 }
  0x50   : > { %p3718_p11 = pnand %p3716_p10, %p3713_p9 }
  0x52   : > { %3721 = shalt.err (!%p3718_p11)
}
  0x53   : > { %s3722_s17 = scalar_lea.vmem %s3981_s11, 1024  ;;  %p3730_p1 = scmp.lt.s32.totalorder %s3981_s11, %s3981_s11 }
  0x54   : > { %p3723_p12 = scmp.ne.s32.totalorder %s3981_s11, %s3722_s17  ;;  %p3731_p4 = scmp.lt.s32.totalorder %s3722_s17, %s3722_s17 }
  0x56   : > { %p3725_p13 = pnand %p3723_p12, %p3957_p7  ;;  %p3732_p6 = por %p3731_p4, %p3730_p1 }
  0x58   : > { %p3726_p0 = pneg %p3725_p13 }
  0x5a   : > { %p3733_p3 = pnand %p3732_p6, %p3726_p0 }
  0x5c   : > { %3736 = shalt.err (!%p3733_p3)
}
  0x5d   : > { %3410 = dma.hbm_to_vmem [thread:$0]  (!%p3945_p5), %s5018_s12, 1024, %s3981_s11, [#allocation8], %s5042_s5, %s5042_s5, %s3817_s14  }
  0x5e   : > { %p5044_p2 = scmp.ne.s32.totalorder %s5037_s20, 0 }
  0x5f   : > { %p5045_p7 = scmp.ne.s32.totalorder (!%p5044_p2), %s5036_s19, 0 }
  0x60   : > { %506 = sbr.rel (%p5044_p2) target bundleno = 2187 (0x88b), region = 76 }
  0x67   : > { %3784 = dma.done.wait (%p5045_p7), [#allocation5], 1024  }
  0x68   : > { %3786 = vsyncadd (%p5045_p7), [#allocation5], 4294966272 }
  0x69   : > { %3788 = dma.done.wait (%p5045_p7), [#allocation8], 2048  }
  0x6a   : > { %3790 = vsyncadd (%p5045_p7), [#allocation8], 4294965248  ;;  %s2872_s11 = sshll.u32 %s3797_s29, 4  ;;  %p595_p5 = scmp.lt.s32.totalorder %s3797_s29, 2  ;;  %v608_v0 = vlaneseq }
  0x6b   : > { %p578_p8 = scmp.lt.s32.totalorder %s2872_s11, 47  ;;  %p598_p9 = scmp.lt.s32.totalorder %s3801_s30, 1 }
  0x6c   : > { %s596_s20 = scalar_select %p595_p5, %s3797_s29, 2  ;;  %v4048_v1 = vand.u32 127, %v608_v0 }
  0x6d   : > { %s5091_s11 = smov (!%p578_p8, %s2872_s11), 47  ;;  %p611_p10 = scmp.eq.s32.totalorder %s3801_s30, 0 }
  0x6e   : > { %s4053_s21 = scalar_lea.vmem %s5010_s4, %s596_s20  ;;  %vm610_vm0 = vcmp.lt.s32.totalorder %v4048_v1, 32  ;;  %s2873_s14 = sshll.u32 %s5091_s11, 3 }
  0x6f   : > { %p612_p11 = scmp.eq.s32.totalorder %s3797_s29, 0  ;;  %s4061_s25 = scalar_lea.vmem %s5007_s1, %s2873_s14 }
  0x70   : > { %s4066_s22 = scalar_lea.vmem %s5008_s2, %s2873_s14  ;;  %s4071_s17 = scalar_lea.vmem %s5009_s3, %s2873_s14 }
  0x71   : > { %p613_p12 = pnand %p612_p11, %p611_p10 }
  0x72   : > { %s599_s10 = scalar_select %p598_p9, %s3801_s30, 1 }
  0x73   : > { %616 = sbr.rel (%p613_p12) target bundleno = 376 (0x178), region = 92  ;;  %v3472_v2 = vld [vmem:[#allocation4] sm:$0xff] (!%p613_p12)   ;;  %v3820_v3 = vmov (!%p613_p12), 0.0   ;;  %v3473_v4 = vld [vmem:[#allocation4 + $0x8] sm:$0xff] (!%p613_p12)   ;;  %v3474_v5 = vld [vmem:[#allocation4 + $0x10] sm:$0xff] (!%p613_p12)   ;;  %s5046_s26 = sld [smem:[#allocation17_spill]] (!%p613_p12) }
  0x74   : > { %s3070_s27 = sshll.u32 %s599_s10, 7  ;;  %s2880_s11 = sshll.u32 %s599_s10, 1  ;;  %617 = vst [vmem:[#allocation10] sm:$0xff] (!%p613_p12), %v3820_v3  ;;  %3169 = vmatprep.subr.bf16.mxu0 (!%p613_p12), %v3472_v2  ;;  %3369 = vmatprep.subr.bf16.mxu1 (!%p613_p12), %v3472_v2  ;;  %v3475_v6 = vld [vmem:[#allocation4 + $0x18] sm:$0xff] (!%p613_p12)   ;;  %v618_v7 = vld [vmem:[%s5006_s0] sm:$0xff] (!%p613_p12)  ;;  %v619_v8 = vld [vmem:[%s5006_s0 + $0x8] sm:$0xff] (!%p613_p12) }
  0x75   : > { %s4079_s23 = scalar_lea.vmem %s5014_s8, %s3070_s27  ;;  %s4084_s18 = scalar_lea.vmem %s5015_s9, %s2880_s11  ;;  %3170 = vmatpush3.bf16.msra.mxu0 (!%p613_p12), %v3472_v2  ;;  %3377 = vmatpush3.bf16.msra.mxu1 (!%p613_p12), %v3472_v2  ;;  %v626_v9 = vld [vmem:[%s5006_s0 + $0x40] sm:$0xff] (!%p613_p12)  ;;  %v634_v10 = vpack.c.bf16 (!%p613_p12), %v619_v8, %v618_v7  ;;  %v627_v11 = vld [vmem:[%s5006_s0 + $0x48] sm:$0xff] (!%p613_p12)  ;;  %v3478_v15 = vld [vmem:[#allocation4 + $0x30] sm:$0xff] (!%p613_p12)  }
  0x76   : > { %3171 = vmatprep.subr.bf16.mxu0 (!%p613_p12), %v3473_v4  ;;  %3370 = vmatprep.subr.bf16.mxu1 (!%p613_p12), %v3473_v4  ;;  %v638_v12 = vpack.c.bf16 (!%p613_p12), %v627_v11, %v626_v9  ;;  %v3476_v13 = vld [vmem:[#allocation4 + $0x20] sm:$0xff] (!%p613_p12)   ;;  %v3477_v14 = vld [vmem:[#allocation4 + $0x28] sm:$0xff] (!%p613_p12)   ;;  %v3479_v16 = vld [vmem:[#allocation4 + $0x38] sm:$0xff] (!%p613_p12)  }
  0x77   : > { %3185 = vmatprep.mubr.bf16.mxu0 (!%p613_p12), %v634_v10  ;;  %v620_v17 = vld [vmem:[%s5006_s0 + $0x10] sm:$0xff] (!%p613_p12)  ;;  %v621_v18 = vld [vmem:[%s5006_s0 + $0x18] sm:$0xff] (!%p613_p12)  ;;  %v622_v21 = vld [vmem:[%s5006_s0 + $0x20] sm:$0xff] (!%p613_p12) }
  0x78   : > { %3193 = vmatprep.mubr.bf16.mxu1 (!%p613_p12), %v638_v12  ;;  %v628_v19 = vld [vmem:[%s5006_s0 + $0x50] sm:$0xff] (!%p613_p12)  ;;  %v629_v20 = vld [vmem:[%s5006_s0 + $0x58] sm:$0xff] (!%p613_p12)  ;;  %v623_v22 = vld [vmem:[%s5006_s0 + $0x28] sm:$0xff] (!%p613_p12)  ;;  %v635_v25 = vpack.c.bf16 (!%p613_p12), %v621_v18, %v620_v17 }
  0x79   : > { %3172 = vmatpush3.bf16.msra.mxu0 (!%p613_p12), %v3473_v4  ;;  %3378 = vmatpush3.bf16.msra.mxu1 (!%p613_p12), %v3473_v4  ;;  %v630_v23 = vld [vmem:[%s5006_s0 + $0x60] sm:$0xff] (!%p613_p12)  ;;  %v631_v24 = vld [vmem:[%s5006_s0 + $0x68] sm:$0xff] (!%p613_p12)  ;;  %v639_v26 = vpack.c.bf16 (!%p613_p12), %v629_v20, %v628_v19  ;;  %v636_v27 = vpack.c.bf16 (!%p613_p12), %v623_v22, %v622_v21  ;;  %v624_v29 = vld [vmem:[%s5006_s0 + $0x30] sm:$0xff] (!%p613_p12) }
  0x7a   : > { %3173 = vmatprep.subr.bf16.mxu0 %v3474_v5  ;;  %3371 = vmatprep.subr.bf16.mxu1 %v3474_v5  ;;  %v640_v28 = vpack.c.bf16 %v631_v24, %v630_v23  ;;  %v625_v30 = vld [vmem:[%s5006_s0 + $0x38] sm:$0xff]  ;;  %v632_v31 = vld [vmem:[%s5006_s0 + $0x70] sm:$0xff]  ;;  %v2881_v35 = vld [vmem:[%s5046_s26] ss:$0 sm:$0xff] }
  0x7b   : > { %v633_v32 = vld [vmem:[%s5006_s0 + $0x78] sm:$0xff]  ;;  %v637_v33 = vpack.c.bf16 %v625_v30, %v624_v29 }
  0x7c   : > { %v641_v34 = vpack.c.bf16 %v633_v32, %v632_v31 }
  0x7d   : > { %3174 = vmatpush3.bf16.msra.mxu0 %v3474_v5  ;;  %3379 = vmatpush3.bf16.msra.mxu1 %v3474_v5 }
  0x7e   : > { %3175 = vmatprep.subr.bf16.mxu0 %v3475_v6  ;;  %3372 = vmatprep.subr.bf16.mxu1 %v3475_v6 }
  0x81   : > { %3176 = vmatpush3.bf16.msra.mxu0 %v3475_v6  ;;  %3380 = vmatpush3.bf16.msra.mxu1 %v3475_v6 }
  0x82   : > { %3177 = vmatprep.subr.bf16.mxu0 %v3476_v13  ;;  %3373 = vmatprep.subr.bf16.mxu1 %v3476_v13 }
  0x85   : > { %3178 = vmatpush3.bf16.msra.mxu0 %v3476_v13  ;;  %3381 = vmatpush3.bf16.msra.mxu1 %v3476_v13 }
  0x86   : > { %3179 = vmatprep.subr.bf16.mxu0 %v3477_v14  ;;  %3374 = vmatprep.subr.bf16.mxu1 %v3477_v14 }
  0x89   : > { %3180 = vmatpush3.bf16.msra.mxu0 %v3477_v14  ;;  %3382 = vmatpush3.bf16.msra.mxu1 %v3477_v14 }
  0x8a   : > { %3181 = vmatprep.subr.bf16.mxu0 %v3478_v15  ;;  %3375 = vmatprep.subr.bf16.mxu1 %v3478_v15 }
  0x8d   : > { %3182 = vmatpush3.bf16.msra.mxu0 %v3478_v15  ;;  %3383 = vmatpush3.bf16.msra.mxu1 %v3478_v15 }
  0x8e   : > { %3183 = vmatprep.subr.bf16.mxu0 %v3479_v16  ;;  %3376 = vmatprep.subr.bf16.mxu1 %v3479_v16 }
  0x91   : > { %3184 = vmatpush3.bf16.msra.mxu0 %v3479_v16  ;;  %3384 = vmatpush3.bf16.msra.mxu1 %v3479_v16 }
  0x94   : > { %3186 = vmatmul.mubr.bf16.vlgmr.msra.gmra.mrb[0].mxu0 %v635_v25  ;;  %3194 = vmatmul.mubr.bf16.vlgmr.msra.gmra.mrb[0].mxu1 %v639_v26 }
  0x95   : > { %3189 = vmatprep.mubr.bf16.mxu0 %v636_v27  ;;  %3197 = vmatprep.mubr.bf16.mxu1 %v640_v28 }
  0x9c   : > { %3190 = vmatmul.mubr.bf16.gmra.mrb[4].mxu0 %v637_v33  ;;  %3198 = vmatmul.mubr.bf16.gmra.mrb[4].mxu1 %v641_v34 }
 0x167   : > { %v3187_v36 = vpop.f32.mrb[0].mxu0  ;;  %v3195_v37 = vpop.f32.mrb[0].mxu1 }
 0x168   : > { %v756_v38 = vadd.f32 %v3187_v36, %v2881_v35  ;;  %v788_v39 = vadd.f32 %v3195_v37, %v2881_v35  ;;  %v747_v40 = vpop.f32.mrb[1].mxu0  ;;  %v779_v41 = vpop.f32.mrb[1].mxu1 }
 0x169   : > { %v748_v42 = vadd.f32 %v2881_v35, %v747_v40  ;;  %v780_v43 = vadd.f32 %v2881_v35, %v779_v41  ;;  %v3188_v44 = vpop.f32.mrb[2].mxu0  ;;  %v3196_v45 = vpop.f32.mrb[2].mxu1 }
 0x16a   : > { %v812_v46 = vmax.f32 %v756_v38, 0.0  ;;  %v820_v47 = vmax.f32 %v788_v39, 0.0  ;;  %v759_v48 = vadd.f32 %v3188_v44, %v2881_v35  ;;  %v791_v49 = vadd.f32 %v3196_v45, %v2881_v35  ;;  %v750_v50 = vpop.f32.mrb[3].mxu0  ;;  %v782_v51 = vpop.f32.mrb[3].mxu1 }
 0x16b   : > { %v810_v52 = vmax.f32 %v748_v42, 0.0  ;;  %v818_v53 = vmax.f32 %v780_v43, 0.0  ;;  %v751_v54 = vadd.f32 %v2881_v35, %v750_v50  ;;  %v783_v55 = vadd.f32 %v2881_v35, %v782_v51 }
 0x16c   : > { %828 = vst [vmem:[#allocation2 + $0x10] sm:$0xff] %v812_v46  ;;  %836 = vst [vmem:[#allocation2 + $0x50] sm:$0xff] %v820_v47  ;;  %v813_v56 = vmax.f32 %v759_v48, 0.0  ;;  %v821_v57 = vmax.f32 %v791_v49, 0.0 }
 0x16d   : > { %826 = vst [vmem:[#allocation2] sm:$0xff] %v810_v52  ;;  %834 = vst [vmem:[#allocation2 + $0x40] sm:$0xff] %v818_v53  ;;  %v811_v58 = vmax.f32 %v751_v54, 0.0  ;;  %v819_v59 = vmax.f32 %v783_v55, 0.0 }
 0x16e   : > { %829 = vst [vmem:[#allocation2 + $0x18] sm:$0xff] %v813_v56  ;;  %837 = vst [vmem:[#allocation2 + $0x58] sm:$0xff] %v821_v57 }
 0x16f   : > { %827 = vst [vmem:[#allocation2 + $0x8] sm:$0xff] %v811_v58  ;;  %835 = vst [vmem:[#allocation2 + $0x48] sm:$0xff] %v819_v59  ;;  %v3191_v60 = vpop.f32.mrb[4].mxu0  ;;  %v3199_v61 = vpop.f32.mrb[4].mxu1 }
 0x170   : > { %v772_v62 = vadd.f32 %v3191_v60, %v2881_v35  ;;  %v804_v63 = vadd.f32 %v3199_v61, %v2881_v35  ;;  %v763_v2 = vpop.f32.mrb[5].mxu0  ;;  %v795_v3 = vpop.f32.mrb[5].mxu1 }
 0x171   : > { %v764_v4 = vadd.f32 %v2881_v35, %v763_v2  ;;  %v796_v5 = vadd.f32 %v2881_v35, %v795_v3  ;;  %v3192_v6 = vpop.f32.mrb[6].mxu0  ;;  %v3200_v7 = vpop.f32.mrb[6].mxu1 }
 0x172   : > { %v816_v8 = vmax.f32 %v772_v62, 0.0  ;;  %v824_v9 = vmax.f32 %v804_v63, 0.0  ;;  %v775_v10 = vadd.f32 %v3192_v6, %v2881_v35  ;;  %v807_v11 = vadd.f32 %v3200_v7, %v2881_v35  ;;  %v766_v12 = vpop.f32.mrb[7].mxu0  ;;  %v798_v13 = vpop.f32.mrb[7].mxu1 }
 0x173   : > { %v814_v14 = vmax.f32 %v764_v4, 0.0  ;;  %v822_v15 = vmax.f32 %v796_v5, 0.0  ;;  %v767_v16 = vadd.f32 %v2881_v35, %v766_v12  ;;  %v799_v17 = vadd.f32 %v2881_v35, %v798_v13 }
 0x174   : > { %832 = vst [vmem:[#allocation2 + $0x30] sm:$0xff] %v816_v8  ;;  %840 = vst [vmem:[#allocation2 + $0x70] sm:$0xff] %v824_v9  ;;  %v817_v18 = vmax.f32 %v775_v10, 0.0  ;;  %v825_v19 = vmax.f32 %v807_v11, 0.0 }
 0x175   : > { %830 = vst [vmem:[#allocation2 + $0x20] sm:$0xff] %v814_v14  ;;  %838 = vst [vmem:[#allocation2 + $0x60] sm:$0xff] %v822_v15  ;;  %v815_v20 = vmax.f32 %v767_v16, 0.0  ;;  %v823_v21 = vmax.f32 %v799_v17, 0.0 }
 0x176   : > { %833 = vst [vmem:[#allocation2 + $0x38] sm:$0xff] %v817_v18  ;;  %841 = vst [vmem:[#allocation2 + $0x78] sm:$0xff] %v825_v19 }
 0x177   : > { %831 = vst [vmem:[#allocation2 + $0x28] sm:$0xff] %v815_v20  ;;  %839 = vst [vmem:[#allocation2 + $0x68] sm:$0xff] %v823_v21 }
 0x178 PF: > { %p2890_p13 = scmp.ne.s32.totalorder %s3797_s29, 0 }
 0x179   : > { %v3821_v22 = vmov (!%p2890_p13), 0.0  }
 0x17a   : > { %844 = sbr.rel (%p2890_p13) target bundleno = 386 (0x182), region = 96  ;;  %845 = vst [vmem:[#allocation3] sm:$0xff] (!%p2890_p13), %v3821_v22  ;;  %846 = vst [vmem:[#allocation3 + $0x8] sm:$0xff] (!%p2890_p13), %v3821_v22 }
 0x17b   : > { %847 = vst [vmem:[#allocation3 + $0x10] sm:$0xff] (!%p2890_p13), %v3821_v22  ;;  %848 = vst [vmem:[#allocation3 + $0x18] sm:$0xff] (!%p2890_p13), %v3821_v22 }
 0x17c   : > { %849 = vst [vmem:[#allocation3 + $0x20] sm:$0xff] (!%p2890_p13), %v3821_v22  ;;  %850 = vst [vmem:[#allocation3 + $0x28] sm:$0xff] (!%p2890_p13), %v3821_v22 }
 0x17d   : > { %851 = vst [vmem:[#allocation3 + $0x30] sm:$0xff] (!%p2890_p13), %v3821_v22  ;;  %852 = vst [vmem:[#allocation3 + $0x38] sm:$0xff] (!%p2890_p13), %v3821_v22 }
 0x17e   : > { %853 = vst [vmem:[#allocation3 + $0x40] sm:$0xff] (!%p2890_p13), %v3821_v22  ;;  %854 = vst [vmem:[#allocation3 + $0x48] sm:$0xff] (!%p2890_p13), %v3821_v22 }
 0x17f   : > { %855 = vst [vmem:[#allocation3 + $0x50] sm:$0xff] (!%p2890_p13), %v3821_v22  ;;  %856 = vst [vmem:[#allocation3 + $0x58] sm:$0xff] (!%p2890_p13), %v3821_v22 }
 0x180   : > { %857 = vst [vmem:[#allocation3 + $0x60] sm:$0xff] (!%p2890_p13), %v3821_v22  ;;  %858 = vst [vmem:[#allocation3 + $0x68] sm:$0xff] (!%p2890_p13), %v3821_v22 }
 0x181   : > { %859 = vst [vmem:[#allocation3 + $0x70] sm:$0xff] %v3821_v22  ;;  %860 = vst [vmem:[#allocation3 + $0x78] sm:$0xff] %v3821_v22 }
 0x182 PF: > { %v1007_v23 = vld [vmem:[%s4066_s22 + $0x10] sm:$0xff]  ;;  %v1005_v24 = vld [vmem:[%s4066_s22] sm:$0xff]  ;;  %v3822_v25 = vmov 0   ;;  %v1008_v26 = vld [vmem:[%s4066_s22 + $0x18] sm:$0xff]  ;;  %v3823_v22 = vmov 1.0|1.0  }
 0x183   : > { %3481 = vset.pattern.permute.xlu1 %v3822_v25  ;;  %3480 = vset.pattern.permute.xlu0 %v3822_v25  ;;  %v1006_v27 = vld [vmem:[%s4066_s22 + $0x8] sm:$0xff]  ;;  %v1009_v29 = vld [vmem:[%s4066_s22 + $0x20] sm:$0xff]  ;;  %v1012_v30 = vld [vmem:[%s4066_s22 + $0x38] sm:$0xff]  ;;  %p3020_p0 = scmp.ne.s32.totalorder %s3797_s29, 2 }
 0x184   : > { %1028 = vperm.xlu1 %3481, %v1007_v23   ;;  %1022 = vperm.xlu0 %3480, %v1005_v24   ;;  %v1010_v28 = vld [vmem:[%s4066_s22 + $0x28] sm:$0xff]  ;;  %v1011_v31 = vld [vmem:[%s4066_s22 + $0x30] sm:$0xff]  ;;  %v861_v32 = vld [vmem:[#allocation2] sm:$0xff]  ;;  %p3021_p1 = scmp.ne.s32.totalorder (!%p3020_p0), %s3801_s30, 1 }
 0x185   : > { %v862_v33 = vld [vmem:[#allocation2 + $0x8] sm:$0xff]  ;;  %v863_v34 = vld [vmem:[#allocation2 + $0x10] sm:$0xff]  ;;  %v864_v35 = vld [vmem:[#allocation2 + $0x18] sm:$0xff] }
 0x186   : > { %v877_v36 = vpack.c.bf16 %v862_v33, %v861_v32  ;;  %v878_v37 = vpack.c.bf16 %v864_v35, %v863_v34  ;;  %v865_v38 = vld [vmem:[#allocation2 + $0x20] sm:$0xff]  ;;  %v866_v39 = vld [vmem:[#allocation2 + $0x28] sm:$0xff]  ;;  %v867_v42 = vld [vmem:[#allocation2 + $0x30] sm:$0xff] }
 0x187   : > { %v1014_v40 = vld [vmem:[%s4066_s22 + $0x48] sm:$0xff]  ;;  %v1013_v41 = vld [vmem:[%s4066_s22 + $0x40] sm:$0xff]  ;;  %v868_v43 = vld [vmem:[#allocation2 + $0x38] sm:$0xff]  ;;  %v879_v46 = vpack.c.bf16 %v866_v39, %v865_v38 }
 0x188   : > { %1031 = vperm.xlu1 %3481, %v1008_v26   ;;  %1025 = vperm.xlu0 %3480, %v1006_v27   ;;  %v1016_v44 = vld [vmem:[%s4066_s22 + $0x58] sm:$0xff]  ;;  %v1015_v45 = vld [vmem:[%s4066_s22 + $0x50] sm:$0xff]  ;;  %v880_v47 = vpack.c.bf16 %v868_v43, %v867_v42  ;;  %v869_v48 = vld [vmem:[#allocation2 + $0x40] sm:$0xff] }
 0x189   : > { %3201 = vmatprep.subr.bf16.mxu0 %v877_v36  ;;  %3233 = vmatprep.subr.bf16.mxu1 %v877_v36  ;;  %v870_v49 = vld [vmem:[#allocation2 + $0x48] sm:$0xff]  ;;  %v1017_v51 = vld [vmem:[%s4066_s22 + $0x60] sm:$0xff]  ;;  %v871_v53 = vld [vmem:[#allocation2 + $0x50] sm:$0xff] }
 0x18a   : > { %3202 = vmatpush3.bf16.msra.mxu0 %v877_v36  ;;  %3234 = vmatpush3.bf16.msra.mxu1 %v877_v36  ;;  %v1018_v50 = vld [vmem:[%s4066_s22 + $0x68] sm:$0xff]  ;;  %v881_v52 = vpack.c.bf16 %v870_v49, %v869_v48  ;;  %v872_v54 = vld [vmem:[#allocation2 + $0x58] sm:$0xff]  ;;  %v1019_v56 = vld [vmem:[%s4066_s22 + $0x70] sm:$0xff] }
 0x18b   : > { %3203 = vmatprep.subr.bf16.mxu0 %v878_v37  ;;  %3235 = vmatprep.subr.bf16.mxu1 %v878_v37  ;;  %v1020_v55 = vld [vmem:[%s4066_s22 + $0x78] sm:$0xff]  ;;  %v882_v57 = vpack.c.bf16 %v872_v54, %v871_v53  ;;  %v873_v58 = vld [vmem:[#allocation2 + $0x60] sm:$0xff]  ;;  %v874_v59 = vld [vmem:[#allocation2 + $0x68] sm:$0xff]  ;;  %s3824_s22 = smov 32  }
 0x18c   : > { %1037 = vperm.xlu1 %3481, %v1010_v28   ;;  %1034 = vperm.xlu0 %3480, %v1009_v29   ;;  %v886_v60 = vld [vmem:[%s4071_s17 + $0x8] sm:$0xff]  ;;  %v885_v61 = vld [vmem:[%s4071_s17] sm:$0xff]  ;;  %v883_v62 = vpack.c.bf16 %v874_v59, %v873_v58  ;;  %v875_v63 = vld [vmem:[#allocation2 + $0x70] sm:$0xff] }
 0x18d   : > { %v876_v2 = vld [vmem:[#allocation2 + $0x78] sm:$0xff]  ;;  %v887_v4 = vld [vmem:[%s4071_s17 + $0x10] sm:$0xff]  ;;  %v890_v6 = vld [vmem:[%s4071_s17 + $0x28] sm:$0xff] }
 0x18e   : > { %3204 = vmatpush3.bf16.msra.mxu0 %v878_v37  ;;  %3236 = vmatpush3.bf16.msra.mxu1 %v878_v37  ;;  %v888_v3 = vld [vmem:[%s4071_s17 + $0x18] sm:$0xff]  ;;  %v884_v5 = vpack.c.bf16 %v876_v2, %v875_v63  ;;  %v889_v7 = vld [vmem:[%s4071_s17 + $0x20] sm:$0xff]  ;;  %v891_v9 = vld [vmem:[%s4071_s17 + $0x30] sm:$0xff] }
 0x18f   : > { %3205 = vmatprep.subr.bf16.mxu0 %v879_v46  ;;  %3237 = vmatprep.subr.bf16.mxu1 %v879_v46  ;;  %v892_v8 = vld [vmem:[%s4071_s17 + $0x38] sm:$0xff]  ;;  %v894_v10 = vld [vmem:[%s4071_s17 + $0x48] sm:$0xff]  ;;  %v893_v11 = vld [vmem:[%s4071_s17 + $0x40] sm:$0xff] }
 0x190   : > { %1043 = vperm.xlu1 %3481, %v1012_v30   ;;  %1040 = vperm.xlu0 %3480, %v1011_v31   ;;  %v896_v12 = vld [vmem:[%s4071_s17 + $0x58] sm:$0xff]  ;;  %v895_v13 = vld [vmem:[%s4071_s17 + $0x50] sm:$0xff]  ;;  %v898_v14 = vld [vmem:[%s4071_s17 + $0x68] sm:$0xff] }
 0x191   : > { %v897_v15 = vld [vmem:[%s4071_s17 + $0x60] sm:$0xff]  ;;  %v900_v16 = vld [vmem:[%s4071_s17 + $0x78] sm:$0xff]  ;;  %v899_v17 = vld [vmem:[%s4071_s17 + $0x70] sm:$0xff] }
 0x192   : > { %3206 = vmatpush3.bf16.msra.mxu0 %v879_v46  ;;  %3238 = vmatpush3.bf16.msra.mxu1 %v879_v46  ;;  %v3484_v53 = vld [vmem:[%s4079_s23 + $0x4] ss:$8 sps:$4 sm:$0xff]   ;;  %v3487_v54 = vld [vmem:[%s4079_s23 + $0x14] ss:$8 sps:$4 sm:$0xff]   ;;  %v3491_v59 = vld [vmem:[%s4079_s23 + $0x30] ss:$8 sps:$4 sm:$0xff]  }
 0x193   : > { %3207 = vmatprep.subr.bf16.mxu0 %v880_v47  ;;  %3239 = vmatprep.subr.bf16.mxu1 %v880_v47  ;;  %v3493_v58 = vld [vmem:[%s4079_s23 + $0x34] ss:$8 sps:$4 sm:$0xff]   ;;  %v3497_v63 = vld [vmem:[%s4079_s23 + $0x50] ss:$8 sps:$4 sm:$0xff]   ;;  %v3502_v2 = vld [vmem:[%s4079_s23 + $0x64] ss:$8 sps:$4 sm:$0xff]  }
 0x194   : > { %1049 = vperm.xlu1 %3481, %v1014_v40   ;;  %1046 = vperm.xlu0 %3480, %v1013_v41  }
 0x196   : > { %3208 = vmatpush3.bf16.msra.mxu0 %v880_v47  ;;  %3240 = vmatpush3.bf16.msra.mxu1 %v880_v47 }
 0x197   : > { %3209 = vmatprep.subr.bf16.mxu0 %v881_v52  ;;  %3241 = vmatprep.subr.bf16.mxu1 %v881_v52 }
 0x198   : > { %1055 = vperm.xlu1 %3481, %v1016_v44   ;;  %1052 = vperm.xlu0 %3480, %v1015_v45  }
 0x19a   : > { %3210 = vmatpush3.bf16.msra.mxu0 %v881_v52  ;;  %3242 = vmatpush3.bf16.msra.mxu1 %v881_v52  ;;  %v3482_v52 = vld [vmem:[%s4079_s23] ss:$8 sps:$4 sm:$0xff]  }
 0x19b   : > { %3211 = vmatprep.subr.bf16.mxu0 %v882_v57  ;;  %3243 = vmatprep.subr.bf16.mxu1 %v882_v57 }
 0x19c   : > { %1061 = vperm.xlu1 %3481, %v1018_v50   ;;  %1058 = vperm.xlu0 %3480, %v1017_v51  }
 0x19e   : > { %3212 = vmatpush3.bf16.msra.mxu0 %v882_v57  ;;  %3244 = vmatpush3.bf16.msra.mxu1 %v882_v57  ;;  %v3488_v57 = vld [vmem:[%s4079_s23 + $0x20] ss:$8 sps:$4 sm:$0xff]  }
 0x19f   : > { %3213 = vmatprep.subr.bf16.mxu0 %v883_v62  ;;  %3245 = vmatprep.subr.bf16.mxu1 %v883_v62 }
 0x1a0   : > { %1067 = vperm.xlu1 %3481, %v1020_v55   ;;  %1064 = vperm.xlu0 %3480, %v1019_v56   ;;  %v3485_v55 = vld [vmem:[%s4079_s23 + $0x10] ss:$8 sps:$4 sm:$0xff]   ;;  %v3490_v56 = vld [vmem:[%s4079_s23 + $0x24] ss:$8 sps:$4 sm:$0xff]  }
 0x1a2   : > { %3214 = vmatpush3.bf16.msra.mxu0 %v883_v62  ;;  %3246 = vmatpush3.bf16.msra.mxu1 %v883_v62  ;;  %v3499_v62 = vld [vmem:[%s4079_s23 + $0x54] ss:$8 sps:$4 sm:$0xff]  }
 0x1a3   : > { %3215 = vmatprep.subr.bf16.mxu0 %v884_v5  ;;  %3247 = vmatprep.subr.bf16.mxu1 %v884_v5 }
 0x1a4   : > { %905 = vperm.xlu1 %3481, %v886_v60   ;;  %902 = vperm.xlu0 %3480, %v885_v61   ;;  %v3496_v60 = vld [vmem:[%s4079_s23 + $0x44] ss:$8 sps:$4 sm:$0xff]   ;;  %v3494_v61 = vld [vmem:[%s4079_s23 + $0x40] ss:$8 sps:$4 sm:$0xff]  }
 0x1a6   : > { %3216 = vmatpush3.bf16.msra.mxu0 %v884_v5  ;;  %3248 = vmatpush3.bf16.msra.mxu1 %v884_v5  ;;  %v3503_v5 = vld [vmem:[%s4079_s23 + $0x70] ss:$8 sps:$4 sm:$0xff]  }
 0x1a7   : > { %1499 = vmatprep.subr.bf16.mxu0 %v3484_v53 }
 0x1a8   : > { %911 = vperm.xlu1 %3481, %v888_v3   ;;  %908 = vperm.xlu0 %3480, %v887_v4   ;;  %v3500_v3 = vld [vmem:[%s4079_s23 + $0x60] ss:$8 sps:$4 sm:$0xff]   ;;  %v3505_v4 = vld [vmem:[%s4079_s23 + $0x74] ss:$8 sps:$4 sm:$0xff]  }
 0x1ac   : > { %917 = vperm.xlu1 %3481, %v890_v6   ;;  %914 = vperm.xlu0 %3480, %v889_v7  }
 0x1b0   : > { %923 = vperm.xlu1 %3481, %v892_v8   ;;  %920 = vperm.xlu0 %3480, %v891_v9  }
 0x1b4   : > { %929 = vperm.xlu1 %3481, %v894_v10   ;;  %926 = vperm.xlu0 %3480, %v893_v11  }
 0x1b8   : > { %935 = vperm.xlu1 %3481, %v896_v12   ;;  %932 = vperm.xlu0 %3480, %v895_v13  }
 0x1bc   : > { %941 = vperm.xlu1 %3481, %v898_v14   ;;  %938 = vperm.xlu0 %3480, %v897_v15  }
 0x1c0   : > { %947 = vperm.xlu1 %3481, %v900_v16   ;;  %944 = vperm.xlu0 %3480, %v899_v17  }
 0x203   : > { %v1029_v18 = vpop.permute.xlu1 %1028  ;;  %v1023_v19 = vpop.permute.xlu0 %1022 }
 0x204   : > { %vm1071_vm1 = vcmp.eq.s32.totalorder %v1029_v18, %v4048_v1  ;;  %vm1069_vm4 = vcmp.eq.s32.totalorder %v1023_v19, %v4048_v1 }
 0x207   : > { %v1032_v20 = vpop.permute.xlu1 %1031  ;;  %v1026_v21 = vpop.permute.xlu0 %1025 }
 0x208   : > { %vm1072_vm2 = vcmp.eq.s32.totalorder %v1032_v20, %v4048_v1  ;;  %vm1070_vm3 = vcmp.eq.s32.totalorder %v1026_v21, %v4048_v1 }
 0x209   : > { %vm2925_vm5 = vmpackc.low %vm1072_vm2, %vm1071_vm1 }
 0x20a   : > { %vm2923_vm6 = vmpackc.low %vm1070_vm3, %vm1069_vm4 }
 0x20b   : > { %3217 = vmatprep.mubr.msk.bf16.mxu0 %vm2923_vm6, %v3823_v22  ;;  %v1038_v23 = vpop.permute.xlu1 %1037  ;;  %v1035_v24 = vpop.permute.xlu0 %1034 }
 0x20c   : > { %vm1074_vm7 = vcmp.eq.s32.totalorder %v1038_v23, %v4048_v1  ;;  %vm1073_vm8 = vcmp.eq.s32.totalorder %v1035_v24, %v4048_v1  ;;  %3218 = vmatmul.mubr.msk.bf16.vlgmr.msra.gmra.mrb[0].mxu0 %vm2925_vm5, %v3823_v22 }
 0x20d   : > { %vm2927_vm9 = vmpackc.low %vm1074_vm7, %vm1073_vm8  ;;  %1500 = vmatpush1.bf16.msra.mxu0 %v3482_v52 }
 0x20e   : > { %3221 = vmatprep.mubr.msk.bf16.mxu0 %vm2927_vm9, %v3823_v22  ;;  %1501 = vmatprep.subr.bf16.mxu0 %v3487_v54 }
 0x20f   : > { %v1044_v26 = vpop.permute.xlu1 %1043  ;;  %v1041_v27 = vpop.permute.xlu0 %1040 }
 0x210   : > { %vm1076_vm10 = vcmp.eq.s32.totalorder %v1044_v26, %v4048_v1  ;;  %vm1075_vm11 = vcmp.eq.s32.totalorder %v1041_v27, %v4048_v1 }
 0x211   : > { %vm2929_vm12 = vmpackc.low %vm1076_vm10, %vm1075_vm11  ;;  %1502 = vmatpush1.bf16.msra.mxu0 %v3485_v55 }
 0x212   : > { %1503 = vmatprep.subr.bf16.mxu0 %v3490_v56 }
 0x213   : > { %v1050_v28 = vpop.permute.xlu1 %1049  ;;  %v1047_v29 = vpop.permute.xlu0 %1046 }
 0x214   : > { %vm1078_vm13 = vcmp.eq.s32.totalorder %v1050_v28, %v4048_v1  ;;  %vm1077_vm14 = vcmp.eq.s32.totalorder %v1047_v29, %v4048_v1  ;;  %3222 = vmatmul.mubr.msk.bf16.gmra.mrb[4].mxu0 %vm2929_vm12, %v3823_v22 }
 0x215   : > { %vm2931_vm15 = vmpackc.low %vm1078_vm13, %vm1077_vm14  ;;  %1504 = vmatpush1.bf16.msra.mxu0 %v3488_v57 }
 0x216   : > { %3225 = vmatprep.mubr.msk.bf16.mxu0 %vm2931_vm15, %v3823_v22  ;;  %1505 = vmatprep.subr.bf16.mxu0 %v3493_v58 }
 0x217   : > { %v1056_v30 = vpop.permute.xlu1 %1055  ;;  %v1053_v31 = vpop.permute.xlu0 %1052 }
 0x218   : > { %vm1080_vm1 = vcmp.eq.s32.totalorder %v1056_v30, %v4048_v1  ;;  %vm1079_vm2 = vcmp.eq.s32.totalorder %v1053_v31, %v4048_v1 }
 0x219   : > { %vm2933_vm3 = vmpackc.low %vm1080_vm1, %vm1079_vm2  ;;  %1506 = vmatpush1.bf16.msra.mxu0 %v3491_v59  ;;  %v1355_v59 = vld [vmem:[%s4061_s25 + $0x20] sm:$0xff] }
 0x21a   : > { %1507 = vmatprep.subr.bf16.mxu0 %v3496_v60  ;;  %v1356_v60 = vld [vmem:[%s4061_s25 + $0x28] sm:$0xff] }
 0x21b   : > { %v1062_v32 = vpop.permute.xlu1 %1061  ;;  %v1059_v33 = vpop.permute.xlu0 %1058 }
 0x21c   : > { %vm1082_vm4 = vcmp.eq.s32.totalorder %v1062_v32, %v4048_v1  ;;  %vm1081_vm5 = vcmp.eq.s32.totalorder %v1059_v33, %v4048_v1  ;;  %3226 = vmatmul.mubr.msk.bf16.gmra.mrb[8].mxu0 %vm2933_vm3, %v3823_v22 }
 0x21d   : > { %vm2935_vm6 = vmpackc.low %vm1082_vm4, %vm1081_vm5  ;;  %1508 = vmatpush1.bf16.msra.mxu0 %v3494_v61 }
 0x21e   : > { %3229 = vmatprep.mubr.msk.bf16.mxu0 %vm2935_vm6, %v3823_v22  ;;  %1509 = vmatprep.subr.bf16.mxu0 %v3499_v62 }
 0x21f   : > { %v1068_v34 = vpop.permute.xlu1 %1067  ;;  %v1065_v35 = vpop.permute.xlu0 %1064 }
 0x220   : > { %vm1084_vm7 = vcmp.eq.s32.totalorder %v1068_v34, %v4048_v1  ;;  %vm1083_vm8 = vcmp.eq.s32.totalorder %v1065_v35, %v4048_v1 }
 0x221   : > { %vm2937_vm9 = vmpackc.low %vm1084_vm7, %vm1083_vm8  ;;  %1510 = vmatpush1.bf16.msra.mxu0 %v3497_v63 }
 0x222   : > { %1511 = vmatprep.subr.bf16.mxu0 %v3502_v2 }
 0x223   : > { %v906_v36 = vpop.permute.xlu1 %905  ;;  %v903_v37 = vpop.permute.xlu0 %902 }
 0x224   : > { %vm950_vm10 = vcmp.eq.s32.totalorder %v906_v36, %v4048_v1  ;;  %vm949_vm11 = vcmp.eq.s32.totalorder %v903_v37, %v4048_v1  ;;  %3230 = vmatmul.mubr.msk.bf16.gmra.mrb[12].mxu0 %vm2937_vm9, %v3823_v22 }
 0x225   : > { %vm2939_vm12 = vmpackc.low %vm950_vm10, %vm949_vm11  ;;  %1531 = vmatprep.mubr.bf16.mxu0 %v3822_v25  ;;  %1512 = vmatpush1.bf16.msra.mxu0 %v3500_v3 }
 0x226   : > { %3249 = vmatprep.mubr.msk.bf16.mxu1 %vm2939_vm12, %v3823_v22  ;;  %1513 = vmatprep.subr.bf16.mxu0 %v3505_v4 }
 0x227   : > { %v912_v38 = vpop.permute.xlu1 %911  ;;  %v909_v39 = vpop.permute.xlu0 %908 }
 0x228   : > { %vm952_vm13 = vcmp.eq.s32.totalorder %v912_v38, %v4048_v1  ;;  %vm951_vm14 = vcmp.eq.s32.totalorder %v909_v39, %v4048_v1 }
 0x229   : > { %vm2941_vm15 = vmpackc.low %vm952_vm13, %vm951_vm14  ;;  %1514 = vmatpush1.bf16.msra.mxu0 %v3503_v5 }
 0x22a   : > { %3250 = vmatmul.mubr.msk.bf16.vlgmr.msra.gmra.mrb[0].mxu1 %vm2941_vm15, %v3823_v22 }
 0x22b   : > { %v918_v40 = vpop.permute.xlu1 %917  ;;  %v915_v41 = vpop.permute.xlu0 %914 }
 0x22c   : > { %vm954_vm1 = vcmp.eq.s32.totalorder %v918_v40, %v4048_v1  ;;  %vm953_vm2 = vcmp.eq.s32.totalorder %v915_v41, %v4048_v1 }
 0x22d   : > { %vm2943_vm3 = vmpackc.low %vm954_vm1, %vm953_vm2 }
 0x22e   : > { %3253 = vmatprep.mubr.msk.bf16.mxu1 %vm2943_vm3, %v3823_v22 }
 0x22f   : > { %v924_v42 = vpop.permute.xlu1 %923  ;;  %v921_v43 = vpop.permute.xlu0 %920 }
 0x230   : > { %vm956_vm4 = vcmp.eq.s32.totalorder %v924_v42, %v4048_v1  ;;  %vm955_vm5 = vcmp.eq.s32.totalorder %v921_v43, %v4048_v1  ;;  %v1351_v42 = vld [vmem:[%s4061_s25] sm:$0xff]  ;;  %v1352_v43 = vld [vmem:[%s4061_s25 + $0x8] sm:$0xff] }
 0x231   : > { %vm2945_vm6 = vmpackc.low %vm956_vm4, %vm955_vm5 }
 0x232   : > { %3254 = vmatmul.mubr.msk.bf16.gmra.mrb[4].mxu1 %vm2945_vm6, %v3823_v22 }
 0x233   : > { %v930_v44 = vpop.permute.xlu1 %929  ;;  %v927_v45 = vpop.permute.xlu0 %926 }
 0x234   : > { %vm958_vm7 = vcmp.eq.s32.totalorder %v930_v44, %v4048_v1  ;;  %vm957_vm8 = vcmp.eq.s32.totalorder %v927_v45, %v4048_v1 }
 0x235   : > { %vm2947_vm9 = vmpackc.low %vm958_vm7, %vm957_vm8 }
 0x236   : > { %3257 = vmatprep.mubr.msk.bf16.mxu1 %vm2947_vm9, %v3823_v22 }
 0x237   : > { %v936_v46 = vpop.permute.xlu1 %935  ;;  %v933_v47 = vpop.permute.xlu0 %932 }
 0x238   : > { %vm960_vm10 = vcmp.eq.s32.totalorder %v936_v46, %v4048_v1  ;;  %vm959_vm11 = vcmp.eq.s32.totalorder %v933_v47, %v4048_v1 }
 0x239   : > { %vm2949_vm12 = vmpackc.low %vm960_vm10, %vm959_vm11 }
 0x23a   : > { %3258 = vmatmul.mubr.msk.bf16.gmra.mrb[8].mxu1 %vm2949_vm12, %v3823_v22 }
 0x23b   : > { %v942_v48 = vpop.permute.xlu1 %941  ;;  %v939_v49 = vpop.permute.xlu0 %938 }
 0x23c   : > { %vm962_vm13 = vcmp.eq.s32.totalorder %v942_v48, %v4048_v1  ;;  %vm961_vm14 = vcmp.eq.s32.totalorder %v939_v49, %v4048_v1 }
 0x23d   : > { %vm2951_vm15 = vmpackc.low %vm962_vm13, %vm961_vm14 }
 0x23e   : > { %3261 = vmatprep.mubr.msk.bf16.mxu1 %vm2951_vm15, %v3823_v22 }
 0x23f   : > { %v948_v50 = vpop.permute.xlu1 %947  ;;  %v945_v51 = vpop.permute.xlu0 %944 }
 0x240   : > { %vm964_vm1 = vcmp.eq.s32.totalorder %v948_v50, %v4048_v1  ;;  %vm963_vm2 = vcmp.eq.s32.totalorder %v945_v51, %v4048_v1  ;;  %v1353_v50 = vld [vmem:[%s4061_s25 + $0x10] sm:$0xff]  ;;  %v1354_v51 = vld [vmem:[%s4061_s25 + $0x18] sm:$0xff] }
 0x241   : > { %vm2953_vm3 = vmpackc.low %vm964_vm1, %vm963_vm2 }
 0x242   : > { %3262 = vmatmul.mubr.msk.bf16.gmra.mrb[12].mxu1 %vm2953_vm3, %v3823_v22 }
 0x2df   : > { %v3219_v6 = vpop.f32.mrb[0].mxu0 }
 0x2e0   : > { %v1159_v7 = vpop.f32.mrb[1].mxu0 }
 0x2e1   : > { %1222 = vrot.lane.b32.xlu0 %v1159_v7, %s3824_s22  ;;  %v3220_v8 = vpop.f32.mrb[2].mxu0  ;;  %v1358_v7 = vld [vmem:[%s4061_s25 + $0x38] sm:$0xff] }
 0x2e2   : > { %v1162_v9 = vpop.f32.mrb[3].mxu0 }
 0x2e3   : > { %1224 = vrot.lane.b32.xlu1 %v1162_v9, %s3824_s22 }
 0x2e5   : > { %1226 = vrot.lane.b32.xlu0 %v3219_v6, %s3824_s22  ;;  %v1357_v6 = vld [vmem:[%s4061_s25 + $0x30] sm:$0xff] }
 0x2e7   : > { %1228 = vrot.lane.b32.xlu1 %v3220_v8, %s3824_s22  ;;  %v3223_v10 = vpop.f32.mrb[4].mxu0 }
 0x2e8   : > { %v1175_v11 = vpop.f32.mrb[5].mxu0 }
 0x2e9   : > { %1230 = vrot.lane.b32.xlu0 %v1175_v11, %s3824_s22  ;;  %v3224_v12 = vpop.f32.mrb[6].mxu0 }
 0x2ea   : > { %v1178_v13 = vpop.f32.mrb[7].mxu0 }
 0x2eb   : > { %1232 = vrot.lane.b32.xlu1 %v1178_v13, %s3824_s22 }
 0x2ed   : > { %1234 = vrot.lane.b32.xlu0 %v3223_v10, %s3824_s22 }
 0x2ef   : > { %1236 = vrot.lane.b32.xlu1 %v3224_v12, %s3824_s22  ;;  %v3227_v14 = vpop.f32.mrb[8].mxu0 }
 0x2f0   : > { %v1191_v15 = vpop.f32.mrb[9].mxu0 }
 0x2f1   : > { %1238 = vrot.lane.b32.xlu0 %v1191_v15, %s3824_s22  ;;  %v3228_v16 = vpop.f32.mrb[10].mxu0  ;;  %v1359_v15 = vld [vmem:[%s4061_s25 + $0x40] sm:$0xff] }
 0x2f2   : > { %v1194_v17 = vpop.f32.mrb[11].mxu0 }
 0x2f3   : > { %1240 = vrot.lane.b32.xlu1 %v1194_v17, %s3824_s22 }
 0x2f5   : > { %1242 = vrot.lane.b32.xlu0 %v3227_v14, %s3824_s22 }
 0x2f7   : > { %1244 = vrot.lane.b32.xlu1 %v3228_v16, %s3824_s22  ;;  %v3231_v18 = vpop.f32.mrb[12].mxu0  ;;  %v1360_v16 = vld [vmem:[%s4061_s25 + $0x48] sm:$0xff] }
 0x2f8   : > { %v1207_v19 = vpop.f32.mrb[13].mxu0 }
 0x2f9   : > { %1246 = vrot.lane.b32.xlu0 %v1207_v19, %s3824_s22  ;;  %v3232_v20 = vpop.f32.mrb[14].mxu0 }
 0x2fa   : > { %v1210_v21 = vpop.f32.mrb[15].mxu0 }
 0x2fb   : > { %1248 = vrot.lane.b32.xlu1 %v1210_v21, %s3824_s22 }
 0x2fd   : > { %1250 = vrot.lane.b32.xlu0 %v3231_v18, %s3824_s22  ;;  %v3251_v23 = vpop.f32.mrb[0].mxu1 }
 0x2fe   : > { %v1288_v24 = vpop.f32.mrb[1].mxu1 }
 0x2ff   : > { %1252 = vrot.lane.b32.xlu1 %v3232_v20, %s3824_s22  ;;  %v3252_v26 = vpop.f32.mrb[2].mxu1 }
 0x300   : > { %v1291_v27 = vpop.f32.mrb[3].mxu1 }
 0x305   : > { %v3255_v28 = vpop.f32.mrb[4].mxu1 }
 0x306   : > { %v1304_v29 = vpop.f32.mrb[5].mxu1 }
 0x307   : > { %v3256_v30 = vpop.f32.mrb[6].mxu1 }
 0x308   : > { %v1307_v31 = vpop.f32.mrb[7].mxu1 }
 0x30d   : > { %v3259_v32 = vpop.f32.mrb[8].mxu1 }
 0x30e   : > { %v1320_v33 = vpop.f32.mrb[9].mxu1 }
 0x30f   : > { %v3260_v34 = vpop.f32.mrb[10].mxu1 }
 0x310   : > { %v1323_v35 = vpop.f32.mrb[11].mxu1 }
 0x315   : > { %v4253_v36 = vpop.f32.mrb[12].mxu1 }
 0x316   : > { %v1336_v37 = vpop.f32.mrb[13].mxu1 }
 0x317   : > { %v4255_v38 = vpop.f32.mrb[14].mxu1 }
 0x318   : > { %v4257_v39 = vpop.f32.mrb[15].mxu1 }
 0x353   : > { %v1223_v40 = vpop.permute.xlu0 %1222 }
 0x354   : > { %v1289_v41 = vadd.f32 %v1288_v24, %v1223_v40 }
 0x355   : > { %v1225_v44 = vpop.permute.xlu1 %1224 }
 0x356   : > { %v1292_v45 = vadd.f32 %v1291_v27, %v1225_v44  ;;  %v1367_v47 = vadd.f32 %v1351_v42, %v1289_v41  ;;  %v1362_v27 = vld [vmem:[%s4061_s25 + $0x58] sm:$0xff]  ;;  %v1364_v42 = vld [vmem:[%s4061_s25 + $0x68] sm:$0xff] }
 0x357   : > { %v1227_v46 = vpop.permute.xlu0 %1226 }
 0x358   : > { %v1368_v48 = vadd.f32 %v1352_v43, %v1292_v45  ;;  %v1297_v49 = vadd.f32 %v3251_v23, %v1227_v46 }
 0x359   : > { %v1229_v52 = vpop.permute.xlu1 %1228 }
 0x35a   : > { %v1383_v53 = vpack.c.bf16 %v1368_v48, %v1367_v47  ;;  %v1300_v54 = vadd.f32 %v3252_v26, %v1229_v52  ;;  %v1369_v56 = vadd.f32 %v1353_v50, %v1297_v49  ;;  %v1361_v26 = vld [vmem:[%s4061_s25 + $0x50] sm:$0xff]  ;;  %v1366_v49 = vld [vmem:[%s4061_s25 + $0x78] sm:$0xff] }
 0x35b   : > { %v1231_v55 = vpop.permute.xlu0 %1230  ;;  %v1365_v48 = vld [vmem:[%s4061_s25 + $0x70] sm:$0xff] }
 0x35c   : > { %v1370_v57 = vadd.f32 %v1354_v51, %v1300_v54  ;;  %v1305_v58 = vadd.f32 %v1304_v29, %v1231_v55  ;;  %1532 = vmatmul.mubr.bf16.vlgmr.msra.gmra.mrb[16].mxu0 %v1383_v53  ;;  %v1407_v54 = vld [vmem:[%s4084_s18] sm:$0x3] }
 0x35d   : > { %v1233_v61 = vpop.permute.xlu1 %1232  ;;  %1541 = vmatprep.mubr.bf16.mxu0 %v3822_v25 }
 0x35e   : > { %v1308_v62 = vadd.f32 %v1307_v31, %v1233_v61  ;;  %v1384_v63 = vpack.c.bf16 %v1370_v57, %v1369_v56  ;;  %v1371_v3 = vadd.f32 %v1355_v59, %v1305_v58  ;;  %v2987_v57 = vld [vmem:[%s4053_s21] ss:$0 sm:$0xff] }
 0x35f   : > { %v1235_v2 = vpop.permute.xlu0 %1234 }
 0x360   : > { %v1372_v4 = vadd.f32 %v1356_v60, %v1308_v62  ;;  %v1313_v5 = vadd.f32 %v3255_v28, %v1235_v2 }
 0x361   : > { %v1237_v8 = vpop.permute.xlu1 %1236 }
 0x362   : > { %v1316_v9 = vadd.f32 %v3256_v30, %v1237_v8  ;;  %v1385_v10 = vpack.c.bf16 %v1372_v4, %v1371_v3  ;;  %v1373_v12 = vadd.f32 %v1357_v6, %v1313_v5 }
 0x363   : > { %v1239_v11 = vpop.permute.xlu0 %1238 }
 0x364   : > { %v1374_v13 = vadd.f32 %v1358_v7, %v1316_v9  ;;  %v1321_v14 = vadd.f32 %v1320_v33, %v1239_v11  ;;  %1542 = vmatmul.mubr.bf16.gmra.mrb[20].mxu0 %v1384_v63 }
 0x365   : > { %v1241_v17 = vpop.permute.xlu1 %1240  ;;  %1551 = vmatprep.mubr.bf16.mxu0 %v3822_v25 }
 0x366   : > { %v1324_v18 = vadd.f32 %v1323_v35, %v1241_v17  ;;  %v1386_v19 = vpack.c.bf16 %v1374_v13, %v1373_v12  ;;  %v1375_v21 = vadd.f32 %v1359_v15, %v1321_v14  ;;  %v1363_v35 = vld [vmem:[%s4061_s25 + $0x60] sm:$0xff] }
 0x367   : > { %v1243_v20 = vpop.permute.xlu0 %1242 }
 0x368   : > { %v1376_v23 = vadd.f32 %v1360_v16, %v1324_v18  ;;  %v1329_v24 = vadd.f32 %v3259_v32, %v1243_v20 }
 0x369   : > { %v1245_v28 = vpop.permute.xlu1 %1244 }
 0x36a   : > { %v1332_v29 = vadd.f32 %v3260_v34, %v1245_v28  ;;  %v1387_v30 = vpack.c.bf16 %v1376_v23, %v1375_v21  ;;  %v1377_v33 = vadd.f32 %v1361_v26, %v1329_v24 }
 0x36b   : > { %v1247_v31 = vpop.permute.xlu0 %1246 }
 0x36c   : > { %v1378_v40 = vadd.f32 %v1362_v27, %v1332_v29  ;;  %v1337_v41 = vadd.f32 %v1336_v37, %v1247_v31  ;;  %1552 = vmatmul.mubr.bf16.gmra.mrb[24].mxu0 %v1385_v10 }
 0x36d   : > { %v1249_v43 = vpop.permute.xlu1 %1248  ;;  %1561 = vmatprep.mubr.bf16.mxu0 %v3822_v25 }
 0x36e   : > { %v1340_v44 = vadd.f32 %v4257_v39, %v1249_v43  ;;  %v1388_v32 = vpack.c.bf16 %v1378_v40, %v1377_v33  ;;  %v1379_v46 = vadd.f32 %v1363_v35, %v1337_v41 }
 0x36f   : > { %v1251_v45 = vpop.permute.xlu0 %1250 }
 0x370   : > { %v1380_v47 = vadd.f32 %v1364_v42, %v1340_v44  ;;  %v1345_v34 = vadd.f32 %v4253_v36, %v1251_v45  ;;  %v4286_v36 = vshrl.u32 %v608_v0, 7 }
 0x371   : > { %v1253_v50 = vpop.permute.xlu1 %1252 }
 0x372   : > { %v1348_v51 = vadd.f32 %v4255_v38, %v1253_v50  ;;  %v1389_v37 = vpack.c.bf16 %v1380_v47, %v1379_v46  ;;  %v1381_v52 = vadd.f32 %v1365_v48, %v1345_v34  ;;  %v1415_v38 = vsub.s32 1, %v4286_v36 }
 0x373   : > { %v2022_v56 = vadd.s32 8, %v4286_v36  ;;  %v1411_v58 = vsub.s32 0, %v4286_v36  ;;  %vm2042_vm4 = vcmp.eq.s32.totalorder %v2987_v57, %v4286_v36 }
 0x374   : > { %v1382_v53 = vadd.f32 %v1366_v49, %v1348_v51  ;;  %1562 = vmatmul.mubr.bf16.gmra.mrb[28].mxu0 %v1386_v19  ;;  %v4290_v55 = vrot.slane %v1407_v54, %v1415_v38 }
 0x375   : > { %1571 = vmatprep.mubr.bf16.mxu0 %v3822_v25  ;;  %vm2043_vm5 = vcmp.eq.s32.totalorder %v2987_v57, %v2022_v56  ;;  %v4300_v61 = vrot.slane %v1407_v54, %v1411_v58 }
 0x376   : > { %v1390_v39 = vpack.c.bf16 %v1382_v53, %v1381_v52  ;;  %vm3004_vm6 = vmpackc.low %vm2043_vm5, %vm2042_vm4 }
 0x377   : > { %3281 = vmatprep.mubr.msk.bf16.mxu1 %vm3004_vm6, %v3823_v22 }
 0x37c   : > { %1572 = vmatmul.mubr.bf16.gmra.mrb[32].mxu0 %v1387_v30 }
 0x37d   : > { %1581 = vmatprep.mubr.bf16.mxu0 %v3822_v25 }
 0x384   : > { %1582 = vmatmul.mubr.bf16.gmra.mrb[36].mxu0 %v1388_v32 }
 0x385   : > { %1591 = vmatprep.mubr.bf16.mxu0 %v3822_v25 }
 0x38c   : > { %1592 = vmatmul.mubr.bf16.gmra.mrb[40].mxu0 %v1389_v37 }
 0x38d   : > { %1601 = vmatprep.mubr.bf16.mxu0 %v3822_v25 }
 0x394   : > { %1602 = vmatmul.mubr.bf16.gmra.mrb[44].mxu0 %v1390_v39 }
 0x42f   : > { %v1533_v59 = vpop.f32.mrb[16].mxu0 }
 0x430   : > { %v1535_v60 = vpop.f32.mrb[17].mxu0  ;;  %v1534_v5 = vadd.f32 %v1533_v59, %v4300_v61 }
 0x431   : > { %v4297_v25 = vadd.f32 %v1535_v60, %v4290_v55  ;;  %v1537_v0 = vpop.f32.mrb[18].mxu0 }
 0x432   : > { %v1539_v62 = vpop.f32.mrb[19].mxu0  ;;  %v1538_v9 = vadd.f32 %v1537_v0, %v4300_v61  ;;  %v2971_v15 = vmul.f32 -1.442695, %v1534_v5 }
 0x433   : > { %v1756_v63 = vand.u32 2147483647, %v4297_v25  ;;  %v4304_v2 = vadd.f32 %v1539_v62, %v4290_v55  ;;  %vm1724_vm11 = vcmp.ne.f32.partialorder %v4297_v25, %v4297_v25 }
 0x434   : > { %v2972_v18 = vmul.f32 -1.442695, %v1538_v9 }
 0x435   : > { %v1772_v3 = vsub.f32 0.0, %v1756_v63  ;;  %v1757_v4 = vand.u32 2147483647, %v4304_v2  ;;  %v1709_v9 = vmax.f32 %v4304_v2, 0.0  ;;  %vm1725_vm12 = vcmp.ne.f32.partialorder %v4304_v2, %v4304_v2 }
 0x437   : > { %v1788_v6 = vmul.f32 1.442695, %v1772_v3  ;;  %v1773_v7 = vsub.f32 0.0, %v1757_v4  ;;  %v1543_v8 = vpop.f32.mrb[20].mxu0 }
 0x438   : > { %v1545_v10 = vpop.f32.mrb[21].mxu0  ;;  %v1544_v12 = vadd.f32 %v1543_v8, %v4300_v61  ;;  %v1708_v8 = vmax.f32 %v4297_v25, 0.0 }
 0x439   : > { %3506 = vpow2.f32 %v1788_v6  ;;  %v1790_v11 = vmul.f32 1.442695, %v1773_v7  ;;  %v4311_v13 = vadd.f32 %v1545_v10, %v4290_v55  ;;  %v1547_v14 = vpop.f32.mrb[22].mxu0 }
 0x43a   : > { %v1549_v16 = vpop.f32.mrb[23].mxu0  ;;  %v2973_v20 = vmul.f32 -1.442695, %v1544_v12  ;;  %v1548_v23 = vadd.f32 %v1547_v14, %v4300_v61 }
 0x43b   : > { %3508 = vpow2.f32 %v1790_v11  ;;  %v1758_v17 = vand.u32 2147483647, %v4311_v13  ;;  %v4315_v19 = vadd.f32 %v1549_v16, %v4290_v55  ;;  %vm1726_vm1 = vcmp.ne.f32.partialorder %v4311_v13, %v4311_v13 }
 0x43c   : > { %3510 = vpow2.f32 %v2971_v15  ;;  %v2974_v33 = vmul.f32 -1.442695, %v1548_v23  ;;  %v1710_v15 = vmax.f32 %v4311_v13, 0.0 }
 0x43d   : > { %v1774_v21 = vsub.f32 0.0, %v1758_v17  ;;  %v1759_v24 = vand.u32 2147483647, %v4315_v19  ;;  %3512 = vpow2.f32 %v2972_v18  ;;  %vm1727_vm2 = vcmp.ne.f32.partialorder %v4315_v19, %v4315_v19 }
 0x43e   : > { %3514 = vpow2.f32 %v2973_v20 }
 0x43f   : > { %v1792_v26 = vmul.f32 1.442695, %v1774_v21  ;;  %v1553_v27 = vpop.f32.mrb[24].mxu0  ;;  %v1775_v28 = vsub.f32 0.0, %v1759_v24 }
 0x440   : > { %v1555_v29 = vpop.f32.mrb[25].mxu0  ;;  %v1554_v42 = vadd.f32 %v1553_v27, %v4300_v61 }
 0x441   : > { %v4320_v30 = vadd.f32 %v1555_v29, %v4290_v55  ;;  %v1557_v31 = vpop.f32.mrb[26].mxu0  ;;  %3516 = vpow2.f32 %v1792_v26  ;;  %v1794_v40 = vmul.f32 1.442695, %v1775_v28 }
 0x442   : > { %v1559_v41 = vpop.f32.mrb[27].mxu0  ;;  %v1558_v46 = vadd.f32 %v1557_v31, %v4300_v61  ;;  %v2975_v34 = vmul.f32 -1.442695, %v1554_v42  ;;  %v1711_v42 = vmax.f32 %v4315_v19, 0.0 }
 0x443   : > { %v4322_v35 = vpop.eup %3506  ;;  %v1760_v43 = vand.u32 2147483647, %v4320_v30  ;;  %3518 = vpow2.f32 %v1794_v40  ;;  %v4331_v47 = vadd.f32 %v1559_v41, %v4290_v55  ;;  %vm1728_vm4 = vcmp.ne.f32.partialorder %v4320_v30, %v4320_v30 }
 0x444   : > { %v1820_v32 = vadd.f32 1.0, %v4322_v35  ;;  %3520 = vpow2.f32 %v2974_v33  ;;  %v2976_v53 = vmul.f32 -1.442695, %v1558_v46  ;;  %v1823_v62 = vmul.f32 -0.5, %v4322_v35 }
 0x445   : > { %v4326_v44 = vpop.eup %3508  ;;  %v1776_v45 = vsub.f32 0.0, %v1760_v43  ;;  %v1761_v39 = vand.u32 2147483647, %v4331_v47  ;;  %v1826_v14 = vand.u32 2147483647, %v4322_v35  ;;  %v1712_v43 = vmax.f32 %v4320_v30, 0.0 }
 0x446   : > { %v3511_v48 = vpop.eup %3510  ;;  %v1829_v49 = vadd.f32 1.0, %v4326_v44  ;;  %3522 = vlog2.f32 %v1820_v32  ;;  %v1832_v3 = vmul.f32 -0.5, %v4326_v44  ;;  %v1824_v18 = vadd.f32 1.0, %v1823_v62 }
 0x447   : > { %v1563_v50 = vpop.f32.mrb[28].mxu0  ;;  %v1796_v51 = vmul.f32 1.442695, %v1776_v45  ;;  %v3513_v52 = vpop.eup %3512  ;;  %v1660_v57 = vadd.f32 1.0, %v3511_v48  ;;  %3524 = vpow2.f32 %v2975_v34  ;;  %v1777_v60 = vsub.f32 0.0, %v1761_v39 }
 0x448   : > { %v1565_v37 = vpop.f32.mrb[29].mxu0  ;;  %v3515_v56 = vpop.eup %3514  ;;  %3526 = vlog2.f32 %v1829_v49  ;;  %v1564_v0 = vadd.f32 %v1563_v50, %v4300_v61  ;;  %v1661_v63 = vadd.f32 1.0, %v3513_v52  ;;  %v1833_v24 = vadd.f32 1.0, %v1832_v3 }
 0x449   : > { %v4336_v38 = vadd.f32 %v1565_v37, %v4290_v55  ;;  %v1567_v54 = vpop.f32.mrb[30].mxu0  ;;  %3528 = vpow2.f32 %v1796_v51  ;;  %v1662_v5 = vadd.f32 1.0, %v3515_v56  ;;  %v1798_v6 = vmul.f32 1.442695, %v1777_v60 }
 0x44a   : > { %v1569_v58 = vpop.f32.mrb[31].mxu0  ;;  %3530 = vpow2.f32 %v2976_v53  ;;  %v2977_v16 = vmul.f32 -1.442695, %v1564_v0  ;;  %v1835_v26 = vand.u32 2147483647, %v4326_v44  ;;  %v1568_v40 = vadd.f32 %v1567_v54, %v4300_v61 }
 0x44b   : > { %v4338_v59 = vpop.eup %3516  ;;  %v1762_v7 = vand.u32 2147483647, %v4336_v38  ;;  %3532 = vrcp.f32 %v1660_v57  ;;  %v4356_v27 = vadd.f32 %v1569_v58, %v4290_v55  ;;  %vm4359_vm7 = vcmp.lt.f32.partialorder %v1826_v14, 0.0004427343 }
 0x44c   : > { %v1838_v10 = vadd.f32 1.0, %v4338_v59  ;;  %3534 = vpow2.f32 %v1798_v6  ;;  %v1825_v45 = vmul.f32 %v4322_v35, %v1824_v18  ;;  %v1841_v46 = vmul.f32 -0.5, %v4338_v59 }
 0x44d   : > { %v4343_v4 = vpop.eup %3518  ;;  %3536 = vrcp.f32 %v1661_v63  ;;  %v1778_v21 = vsub.f32 0.0, %v1762_v7  ;;  %v1713_v50 = vmax.f32 %v4331_v47, 0.0  ;;  %v1763_v51 = vand.u32 2147483647, %v4356_v27 }
 0x44e   : > { %v3521_v12 = vpop.eup %3520  ;;  %v1847_v20 = vadd.f32 1.0, %v4343_v4  ;;  %3538 = vrcp.f32 %v1662_v5  ;;  %v1850_v34 = vmul.f32 -0.5, %v4343_v4  ;;  %v4373_v52 = vmul.f32 %v4326_v44, %v1833_v24 }
 0x44f   : > { %v1573_v11 = vpop.f32.mrb[32].mxu0  ;;  %3540 = vlog2.f32 %v1838_v10  ;;  %v1663_v31 = vadd.f32 1.0, %v3521_v12  ;;  %v1800_v33 = vmul.f32 1.442695, %v1778_v21  ;;  %vm4375_vm8 = vcmp.lt.f32.partialorder %v1835_v26, 0.0004427343 }
 0x450   : > { %v1575_v17 = vpop.f32.mrb[33].mxu0  ;;  %v3523_v29 = vpop.eup %3522  ;;  %3542 = vpow2.f32 %v2977_v16  ;;  %v2978_v35 = vmul.f32 -1.442695, %v1568_v40  ;;  %v1844_v56 = vand.u32 2147483647, %v4338_v59  ;;  %v1714_v57 = vmax.f32 %v4336_v38, 0.0 }
 0x451   : > { %v4352_v23 = vpop.f32.mrb[34].mxu0  ;;  %v3525_v32 = vpop.eup %3524  ;;  %3544 = vlog2.f32 %v1847_v20  ;;  %v1822_v49 = vmul.f32 0.6931472, %v3523_v29  ;;  %v1779_v58 = vsub.f32 0.0, %v1763_v51  ;;  %v1574_v60 = vadd.f32 %v1573_v11, %v4300_v61 }
 0x452   : > { %v1579_v28 = vpop.f32.mrb[35].mxu0  ;;  %v3527_v48 = vpop.eup %3526  ;;  %3546 = vpow2.f32 %v1800_v33  ;;  %v1842_v44 = vadd.f32 1.0, %v1841_v46  ;;  %v1851_v63 = vadd.f32 1.0, %v1850_v34  ;;  %v1853_v3 = vand.u32 2147483647, %v4343_v4 }
 0x453   : > { %v4370_v37 = vpop.eup %3528  ;;  %3548 = vrcp.f32 %v1663_v31  ;;  %v1664_v5 = vadd.f32 1.0, %v3525_v32  ;;  %v1828_v10 = vsel %vm4359_vm7, %v1825_v45, %v1822_v49  ;;  %v1802_v14 = vmul.f32 1.442695, %v1779_v58 }
 0x454   : > { %v3531_v54 = vpop.eup %3530  ;;  %v1856_v12 = vadd.f32 1.0, %v4370_v37  ;;  %v4393_v11 = vadd.f32 %v1575_v17, %v4290_v55  ;;  %v1831_v20 = vmul.f32 0.6931472, %v3527_v48  ;;  %v1859_v21 = vmul.f32 -0.5, %v4370_v37 }
 0x455   : > { %v4382_v62 = vpop.eup %3532  ;;  %v1665_v24 = vadd.f32 1.0, %v3531_v54  ;;  %3550 = vpow2.f32 %v2978_v35  ;;  %vm4402_vm9 = vcmp.lt.f32.partialorder %v1844_v56, 0.0004427343  ;;  %v2979_v31 = vmul.f32 -1.442695, %v1574_v60 }
 0x456   : > { %v4387_v7 = vpop.eup %3534  ;;  %3552 = vpow2.f32 %v1802_v14  ;;  %v4407_v17 = vadd.f32 %v1579_v28, %v4290_v55  ;;  %v1843_v40 = vmul.f32 %v4338_v59, %v1842_v44  ;;  %v1578_v32 = vadd.f32 %v4352_v23, %v4300_v61 }
 0x457   : > { %v1583_v39 = vpop.f32.mrb[36].mxu0  ;;  %v4397_v18 = vpop.eup %3536  ;;  %3554 = vrcp.f32 %v1664_v5  ;;  %v1865_v41 = vadd.f32 1.0, %v4387_v7  ;;  %v4415_v46 = vadd.f32 %v1828_v10, %v1708_v8  ;;  %v4418_v34 = vmul.f32 %v4343_v4, %v1851_v63 }
 0x458   : > { %v1585_v0 = vpop.f32.mrb[37].mxu0  ;;  %v4400_v26 = vpop.eup %3538  ;;  %vm4420_vm10 = vcmp.lt.f32.partialorder %v1853_v3, 0.0004427343  ;;  %3556 = vlog2.f32 %v1856_v12  ;;  %v1764_v59 = vand.u32 2147483647, %v4393_v11  ;;  %v1837_v23 = vsel %vm4375_vm8, %v4373_v52, %v1831_v20 }
 0x459   : > { %v4385_v6 = vpop.f32.mrb[38].mxu0  ;;  %v3541_v33 = vpop.eup %3540  ;;  %v1860_v49 = vadd.f32 1.0, %v1859_v21  ;;  %v1862_v51 = vand.u32 2147483647, %v4370_v37  ;;  %3558 = vrcp.f32 %v1665_v24  ;;  %v1765_v56 = vand.u32 2147483647, %v4407_v17 }
 0x45a   : > { %v4395_v16 = vpop.f32.mrb[39].mxu0  ;;  %v3543_v45 = vpop.eup %3542  ;;  %v1840_v35 = vmul.f32 0.6931472, %v3541_v33  ;;  %3560 = vpow2.f32 %v2979_v31  ;;  %v1780_v54 = vsub.f32 0.0, %v1764_v59  ;;  %v2980_v60 = vmul.f32 -1.442695, %v1578_v32 }
 0x45b   : > { %v3545_v48 = vpop.eup %3544  ;;  %3562 = vlog2.f32 %v1865_v41  ;;  %v1584_v44 = vadd.f32 %v1583_v39, %v4300_v61  ;;  %v1868_v3 = vmul.f32 -0.5, %v4387_v7  ;;  %v1781_v10 = vsub.f32 0.0, %v1765_v56 }
 0x45c   : > { %v4431_v4 = vpop.eup %3546  ;;  %v1804_v5 = vmul.f32 1.442695, %v1780_v54  ;;  %v4446_v12 = vadd.f32 %v1585_v0, %v4290_v55  ;;  %v1849_v20 = vmul.f32 0.6931472, %v3545_v48  ;;  %v1666_v21 = vadd.f32 1.0, %v3543_v45 }
 0x45d   : > { %v4438_v53 = vpop.eup %3548  ;;  %v1874_v52 = vadd.f32 1.0, %v4431_v4  ;;  %v1715_v24 = vmax.f32 %v4356_v27, 0.0  ;;  %v1965_v39 = vadd.f32 %v1837_v23, %v1709_v9  ;;  %v4456_v31 = vmul.f32 %v4370_v37, %v1860_v49 }
 0x45e   : > { %v1806_v33 = vmul.f32 1.442695, %v1781_v10  ;;  %v1846_v41 = vsel %vm4402_vm9, %v1843_v40, %v1840_v35  ;;  %v1871_v32 = vand.u32 2147483647, %v4387_v7  ;;  %v2981_v59 = vmul.f32 -1.442695, %v1584_v44 }
 0x45f   : > { %v4429_v8 = vpop.f32.mrb[40].mxu0  ;;  %3564 = vlog2.f32 %v1874_v52  ;;  %v3551_v0 = vpop.eup %3550  ;;  %vm4463_vm13 = vcmp.lt.f32.partialorder %v1862_v51, 0.0004427343  ;;  %v1869_v9 = vadd.f32 1.0, %v1868_v3  ;;  %v1716_v37 = vmax.f32 %v4393_v11, 0.0 }
 0x460   : > { %v4436_v58 = vpop.f32.mrb[41].mxu0  ;;  %3566 = vpow2.f32 %v1804_v5  ;;  %v4461_v45 = vpop.eup %3552  ;;  %v1766_v23 = vand.u32 2147483647, %v4446_v12  ;;  %v1855_v29 = vsel %vm4420_vm10, %v4418_v34, %v1849_v20  ;;  %v1877_v40 = vmul.f32 -0.5, %v4431_v4 }
 0x461   : > { %v4442_v63 = vpop.f32.mrb[42].mxu0  ;;  %3568 = vpow2.f32 %v2980_v60  ;;  %v4469_v49 = vpop.eup %3554  ;;  %v1883_v51 = vadd.f32 1.0, %v4461_v45  ;;  %v4480_v56 = vadd.f32 %v1846_v41, %v1710_v15  ;;  %v1588_v60 = vadd.f32 %v4385_v6, %v4300_v61 }
 0x462   : > { %v4448_v14 = vpop.f32.mrb[43].mxu0  ;;  %3570 = vpow2.f32 %v1806_v33  ;;  %v3557_v54 = vpop.eup %3556  ;;  %v1782_v52 = vsub.f32 0.0, %v1766_v23  ;;  %v4486_v28 = vadd.f32 %v4395_v16, %v4290_v55  ;;  %vm4492_vm14 = vcmp.lt.f32.partialorder %v1871_v32, 0.0004427343 }
 0x463   : > { %3572 = vrcp.f32 %v1666_v21  ;;  %v4490_v44 = vpop.eup %3558  ;;  %v1667_v5 = vadd.f32 1.0, %v3551_v0  ;;  %v1980_v15 = vsel %vm1724_vm11, %v4297_v25, %v4415_v46  ;;  %v4505_v10 = vadd.f32 %v1855_v29, %v1711_v42 }
 0x464   : > { %3574 = vpow2.f32 %v2981_v59  ;;  %v3561_v16 = vpop.eup %3560  ;;  %v1870_v20 = vmul.f32 %v4387_v7, %v1869_v9  ;;  %v1880_v21 = vand.u32 2147483647, %v4431_v4  ;;  %v1808_v33 = vmul.f32 1.442695, %v1782_v52 }
 0x465   : > { %v3563_v41 = vpop.eup %3562  ;;  %v1858_v32 = vmul.f32 0.6931472, %v3557_v54  ;;  %v1878_v59 = vadd.f32 1.0, %v1877_v40  ;;  %3576 = vlog2.f32 %v1883_v51  ;;  %v1767_v25 = vand.u32 2147483647, %v4486_v28 }
 0x466   : > { %3578 = vpow2.f32 %v1808_v33  ;;  %v2982_v46 = vmul.f32 -1.442695, %v1588_v60  ;;  %v1981_v42 = vsel %vm1725_vm12, %v4304_v2, %v1965_v39  ;;  %v1996_v7 = vmul.f32 %v4382_v62, %v1980_v15 }
 0x467   : > { %v4476_v35 = vpop.f32.mrb[44].mxu0  ;;  %v1886_v23 = vmul.f32 -0.5, %v4461_v45  ;;  %v1668_v29 = vadd.f32 1.0, %v3561_v16  ;;  %v1783_v52 = vsub.f32 0.0, %v1767_v25  ;;  %v1997_v54 = vmul.f32 %v4397_v18, %v1981_v42 }
 0x468   : > { %v4488_v34 = vpop.f32.mrb[45].mxu0  ;;  %v1867_v51 = vmul.f32 0.6931472, %v3563_v41  ;;  %vm4521_vm15 = vcmp.lt.f32.partialorder %v1880_v21, 0.0004427343  ;;  %3580 = vrcp.f32 %v1667_v5  ;;  %v1717_v60 = vmax.f32 %v4407_v17, 0.0 }
 0x469   : > { %v4501_v6 = vpop.f32.mrb[46].mxu0  ;;  %v3565_v9 = vpop.eup %3564  ;;  %v1864_v62 = vsel %vm4463_vm13, %v4456_v31, %v1858_v32  ;;  %v1718_v39 = vmax.f32 %v4446_v12, 0.0  ;;  %v1810_v15 = vmul.f32 1.442695, %v1783_v52  ;;  %v1889_v21 = vand.u32 2147483647, %v4461_v45 }
 0x46a   : > { %v4509_v0 = vpop.f32.mrb[47].mxu0  ;;  %v4519_v40 = vpop.eup %3566  ;;  %v1876_v5 = vmul.f32 0.6931472, %v3565_v9  ;;  %3582 = vpow2.f32 %v2982_v46  ;;  %v2012_v41 = vpack.c.bf16 %v1997_v54, %v1996_v7  ;;  %v1879_v48 = vmul.f32 %v4431_v4, %v1878_v59 }
 0x46b   : > { %v3569_v2 = vpop.eup %3568  ;;  %v1892_v18 = vadd.f32 1.0, %v4519_v40  ;;  %v1887_v31 = vadd.f32 1.0, %v1886_v23  ;;  %3584 = vrcp.f32 %v1668_v29  ;;  %v4543_v32 = vadd.f32 %v4436_v58, %v4290_v55 }
 0x46c   : > { %v4533_v16 = vpop.eup %3570  ;;  %v1873_v42 = vsel %vm4492_vm14, %v1870_v20, %v1867_v51  ;;  %v1669_v52 = vadd.f32 1.0, %v3569_v2  ;;  %3265 = vmatprep.subr.bf16.mxu1 %v2012_v41  ;;  %v4550_v7 = vadd.f32 %v1864_v62, %v1712_v43  ;;  %v1895_v4 = vmul.f32 -0.5, %v4519_v40 }
 0x46d   : > { %v4538_v25 = vpop.eup %3572  ;;  %3586 = vlog2.f32 %v1892_v18  ;;  %v1901_v9 = vadd.f32 1.0, %v4533_v16  ;;  %3266 = vmatpush3.bf16.msra.mxu1 %v2012_v41  ;;  %v1594_v58 = vadd.f32 %v4429_v8, %v4300_v61  ;;  %v1882_v3 = vsel %vm4521_vm15, %v1879_v48, %v1876_v5 }
 0x46e   : > { %v3575_v46 = vpop.eup %3574  ;;  %3588 = vpow2.f32 %v1810_v15  ;;  %vm4557_vm3 = vcmp.lt.f32.partialorder %v1889_v21, 0.0004427343  ;;  %v4563_v59 = vadd.f32 %v4448_v14, %v4290_v55  ;;  %v4567_v23 = vadd.f32 %v1873_v42, %v1713_v50 }
 0x46f   : > { %3590 = vlog2.f32 %v1901_v9  ;;  %v3577_v43 = vpop.eup %3576  ;;  %v1719_v29 = vmax.f32 %v4486_v28, 0.0  ;;  %v1768_v8 = vand.u32 2147483647, %v4543_v32  ;;  %v1598_v54 = vadd.f32 %v4442_v63, %v4300_v61 }
 0x470   : > { %v4573_v51 = vpop.eup %3578  ;;  %v1888_v33 = vmul.f32 %v4461_v45, %v1887_v31  ;;  %v1898_v2 = vand.u32 2147483647, %v4519_v40  ;;  %3592 = vrcp.f32 %v1669_v52  ;;  %v1670_v14 = vadd.f32 1.0, %v3575_v46 }
 0x471   : > { %v4579_v62 = vadd.f32 %v1882_v3, %v1714_v57  ;;  %v1896_v50 = vadd.f32 1.0, %v1895_v4  ;;  %v1910_v18 = vadd.f32 1.0, %v4573_v51  ;;  %v2983_v15 = vmul.f32 -1.442695, %v1594_v58 }
 0x472   : > { %v4582_v5 = vpop.eup %3580  ;;  %v1904_v63 = vmul.f32 -0.5, %v4533_v16  ;;  %v1784_v21 = vsub.f32 0.0, %v1768_v8  ;;  %v1769_v41 = vand.u32 2147483647, %v4563_v59  ;;  %v1982_v45 = vsel %vm1726_vm1, %v4311_v13, %v4480_v56 }
 0x473   : > { %v1885_v48 = vmul.f32 0.6931472, %v3577_v43  ;;  %3594 = vlog2.f32 %v1910_v18  ;;  %v2984_v57 = vmul.f32 -1.442695, %v1598_v54  ;;  %v1983_v31 = vsel %vm1727_vm2, %v4315_v19, %v4505_v10 }
 0x474   : > { %v3583_v42 = vpop.eup %3582  ;;  %vm1729_vm5 = vcmp.ne.f32.partialorder %v4331_v47, %v4331_v47  ;;  %v1913_v52 = vmul.f32 -0.5, %v4573_v51  ;;  %v1812_v9 = vmul.f32 1.442695, %v1784_v21  ;;  %v1785_v13 = vsub.f32 0.0, %v1769_v41 }
 0x475   : > { %v1998_v56 = vmul.f32 %v4400_v26, %v1982_v45  ;;  %v4602_v46 = vpop.eup %3584  ;;  %vm4604_vm6 = vcmp.lt.f32.partialorder %v1898_v2, 0.0004427343  ;;  %v1907_v19 = vand.u32 2147483647, %v4533_v16  ;;  %3596 = vrcp.f32 %v1670_v14 }
 0x476   : > { %v1999_v10 = vmul.f32 %v4438_v53, %v1983_v31  ;;  %v4612_v58 = vadd.f32 %v4488_v34, %v4290_v55  ;;  %v1897_v43 = vmul.f32 %v4519_v40, %v1896_v50  ;;  %v1905_v8 = vadd.f32 1.0, %v1904_v63 }
 0x477   : > { %v3587_v3 = vpop.eup %3586  ;;  %3598 = vpow2.f32 %v1812_v9  ;;  %v1814_v26 = vmul.f32 1.442695, %v1785_v13  ;;  %vm1730_vm7 = vcmp.ne.f32.partialorder %v4336_v38, %v4336_v38  ;;  %vm1731_vm8 = vcmp.ne.f32.partialorder %v4356_v27, %v4356_v27 }
 0x478   : > { %v4615_v54 = vpop.eup %3588  ;;  %v1891_v53 = vsel %vm4557_vm3, %v1888_v33, %v1885_v48  ;;  %v1671_v2 = vadd.f32 1.0, %v3583_v42  ;;  %3600 = vpow2.f32 %v2983_v15  ;;  %v2013_v34 = vpack.c.bf16 %v1999_v10, %v1998_v56 }
 0x479   : > { %v3591_v14 = vpop.eup %3590  ;;  %v1914_v18 = vadd.f32 1.0, %v1913_v52  ;;  %v1916_v40 = vand.u32 2147483647, %v4573_v51  ;;  %v1919_v50 = vadd.f32 1.0, %v4615_v54  ;;  %3602 = vpow2.f32 %v2984_v57 }
 0x47a   : > { %vm4625_vm9 = vcmp.lt.f32.partialorder %v1907_v19, 0.0004427343  ;;  %3604 = vpow2.f32 %v1814_v26  ;;  %3267 = vmatprep.subr.bf16.mxu1 %v2013_v34  ;;  %v1604_v20 = vadd.f32 %v4476_v35, %v4300_v61  ;;  %v1770_v33 = vand.u32 2147483647, %v4612_v58  ;;  %v4632_v15 = vpop.eup %3592 }
 0x47b   : > { %v1894_v21 = vmul.f32 0.6931472, %v3587_v3  ;;  %v1906_v41 = vmul.f32 %v4533_v16, %v1905_v8  ;;  %3606 = vlog2.f32 %v1919_v50  ;;  %v1922_v45 = vmul.f32 -0.5, %v4615_v54  ;;  %3268 = vmatpush3.bf16.msra.mxu1 %v2013_v34 }
 0x47c   : > { %v1971_v48 = vadd.f32 %v1891_v53, %v1715_v24  ;;  %v1903_v57 = vmul.f32 0.6931472, %v3591_v14  ;;  %3608 = vrcp.f32 %v1671_v2  ;;  %v1786_v31 = vsub.f32 0.0, %v1770_v33 }
 0x47d   : > { %vm1732_vm10 = vcmp.ne.f32.partialorder %v4393_v11, %v4393_v11  ;;  %v1915_v35 = vmul.f32 %v4573_v51, %v1914_v18  ;;  %vm4641_vm11 = vcmp.lt.f32.partialorder %v1916_v40, 0.0004427343  ;;  %v1608_v16 = vadd.f32 %v4501_v6, %v4300_v61  ;;  %v3595_v24 = vpop.eup %3594 }
 0x47e   : > { %v4649_v52 = vadd.f32 %v4509_v0, %v4290_v55  ;;  %v2985_v9 = vmul.f32 -1.442695, %v1604_v20  ;;  %v1816_v13 = vmul.f32 1.442695, %v1786_v31  ;;  %v1984_v51 = vsel %vm1728_vm4, %v4320_v30, %v4550_v7 }
 0x47f   : > { %v1985_v56 = vsel %vm1729_vm5, %v4331_v47, %v4567_v23  ;;  %v1900_v61 = vsel %vm4604_vm6, %v1897_v43, %v1894_v21  ;;  %vm1733_vm12 = vcmp.ne.f32.partialorder %v4407_v17, %v4407_v17  ;;  %vm1734_vm13 = vcmp.ne.f32.partialorder %v4446_v12, %v4446_v12  ;;  %v3597_v30 = vpop.eup %3596 }
 0x480   : > { %v1912_v55 = vmul.f32 0.6931472, %v3595_v24  ;;  %v1923_v6 = vadd.f32 1.0, %v1922_v45  ;;  %v1771_v0 = vand.u32 2147483647, %v4649_v52  ;;  %v1909_v7 = vsel %vm4625_vm9, %v1906_v41, %v1903_v57 }
 0x481   : > { %3610 = vpow2.f32 %v1816_v13  ;;  %v2000_v47 = vmul.f32 %v4469_v49, %v1984_v51  ;;  %v2001_v23 = vmul.f32 %v4490_v44, %v1985_v56  ;;  %v4672_v4 = vpop.eup %3598  ;;  %v1986_v3 = vsel %vm1730_vm7, %v4336_v38, %v4579_v62 }
 0x482   : > { %v1918_v19 = vsel %vm4641_vm11, %v1915_v35, %v1912_v55  ;;  %v1787_v10 = vsub.f32 0.0, %v1771_v0  ;;  %v1987_v43 = vsel %vm1731_vm8, %v4356_v27, %v1971_v48  ;;  %v3601_v49 = vpop.eup %3600  ;;  %v1972_v44 = vadd.f32 %v1900_v61, %v1716_v37 }
 0x483   : > { %v1928_v8 = vadd.f32 1.0, %v4672_v4  ;;  %3612 = vpow2.f32 %v2985_v9  ;;  %v2986_v26 = vmul.f32 -1.442695, %v1608_v16  ;;  %v3603_v53 = vpop.eup %3602  ;;  %v1925_v2 = vand.u32 2147483647, %v4615_v54 }
 0x484   : > { %v1818_v34 = vmul.f32 1.442695, %v1787_v10  ;;  %v2014_v14 = vpack.c.bf16 %v2001_v23, %v2000_v47  ;;  %v2002_v38 = vmul.f32 %v4538_v25, %v1986_v3  ;;  %v4690_v62 = vpop.eup %3604  ;;  %v1973_v27 = vadd.f32 %v1909_v7, %v1717_v60 }
 0x485   : > { %v1974_v18 = vadd.f32 %v1918_v19, %v1718_v39  ;;  %3614 = vlog2.f32 %v1928_v8  ;;  %v2003_v37 = vmul.f32 %v4582_v5, %v1987_v43  ;;  %v3607_v40 = vpop.eup %3606  ;;  %v1924_v50 = vmul.f32 %v4615_v54, %v1923_v6 }
 0x486   : > { %v1672_v63 = vadd.f32 1.0, %v3601_v49  ;;  %v1937_v20 = vadd.f32 1.0, %v4690_v62  ;;  %3616 = vpow2.f32 %v1818_v34  ;;  %3269 = vmatprep.subr.bf16.mxu1 %v2014_v14  ;;  %v3609_v25 = vpop.eup %3608  ;;  %v1921_v33 = vmul.f32 0.6931472, %v3607_v40 }
 0x487   : > { %3618 = vpow2.f32 %v2986_v26  ;;  %3270 = vmatpush3.bf16.msra.mxu1 %v2014_v14  ;;  %v2015_v21 = vpack.c.bf16 %v2003_v37, %v2002_v38  ;;  %v1988_v60 = vsel %vm1732_vm10, %v4393_v11, %v1972_v44  ;;  %vm1926_vm14 = vcmp.lt.f32.partialorder %v1925_v2, 0.0004427343 }
 0x488   : > { %v1931_v39 = vmul.f32 -0.5, %v4672_v4  ;;  %v1673_v5 = vadd.f32 1.0, %v3603_v53  ;;  %3620 = vlog2.f32 %v1937_v20  ;;  %v1927_v54 = vsel %vm1926_vm14, %v1924_v50, %v1921_v33 }
 0x489   : > { %3271 = vmatprep.subr.bf16.mxu1 %v2015_v21  ;;  %v1989_v41 = vsel %vm1733_vm12, %v4407_v17, %v1973_v27  ;;  %v2004_v45 = vmul.f32 %v4602_v46, %v1988_v60  ;;  %v1990_v48 = vsel %vm1734_vm13, %v4446_v12, %v1974_v18  ;;  %v1975_v11 = vadd.f32 %v1927_v54, %v1719_v29 }
 0x48a   : > { %3622 = vrcp.f32 %v1672_v63  ;;  %v1940_v31 = vmul.f32 -0.5, %v4690_v62  ;;  %v2005_v35 = vmul.f32 %v4632_v15, %v1989_v41  ;;  %v2006_v42 = vmul.f32 %v3597_v30, %v1990_v48 }
 0x48b   : > { %v3611_v57 = vpop.eup %3610  ;;  %3272 = vmatpush3.bf16.msra.mxu1 %v2015_v21  ;;  %vm1735_vm15 = vcmp.ne.f32.partialorder %v4486_v28, %v4486_v28  ;;  %v1932_v17 = vadd.f32 1.0, %v1931_v39  ;;  %v1934_v24 = vand.u32 2147483647, %v4672_v4  ;;  %3624 = vrcp.f32 %v1673_v5 }
 0x48c   : > { %v1946_v46 = vadd.f32 1.0, %v3611_v57  ;;  %v2016_v12 = vpack.c.bf16 %v2005_v35, %v2004_v45  ;;  %v1991_v29 = vsel %vm1735_vm15, %v4486_v28, %v1975_v11  ;;  %v1941_v51 = vadd.f32 1.0, %v1940_v31 }
 0x48d   : > { %v3613_v16 = vpop.eup %3612  ;;  %v2007_v9 = vmul.f32 %v3609_v25, %v1991_v29  ;;  %v1943_v56 = vand.u32 2147483647, %v4690_v62  ;;  %v1933_v55 = vmul.f32 %v4672_v4, %v1932_v17  ;;  %v1720_v7 = vmax.f32 %v4543_v32, 0.0 }
 0x48e   : > { %3626 = vlog2.f32 %v1946_v46  ;;  %3273 = vmatprep.subr.bf16.mxu1 %v2016_v12  ;;  %v1674_v6 = vadd.f32 1.0, %v3613_v16  ;;  %vm1935_vm1 = vcmp.lt.f32.partialorder %v1934_v24, 0.0004427343  ;;  %v1949_v47 = vmul.f32 -0.5, %v3611_v57  ;;  %v3634_v24 = vld [vmem:[%s4053_s21] ss:$0 sm:$0xff] }
 0x48f   : > { %v3615_v13 = vpop.eup %3614  ;;  %3274 = vmatpush3.bf16.msra.mxu1 %v2016_v12  ;;  %v2017_v0 = vpack.c.bf16 %v2007_v9, %v2006_v42  ;;  %v1942_v43 = vmul.f32 %v4690_v62, %v1941_v51  ;;  %vm1736_vm2 = vcmp.ne.f32.partialorder %v4543_v32, %v4543_v32  ;;  %v1721_v4 = vmax.f32 %v4563_v59, 0.0 }
 0x490   : > { %v3617_v15 = vpop.eup %3616  ;;  %v1930_v61 = vmul.f32 0.6931472, %v3615_v13  ;;  %vm1944_vm3 = vcmp.lt.f32.partialorder %v1943_v56, 0.0004427343  ;;  %v1950_v8 = vadd.f32 1.0, %v1949_v47  ;;  %vm1737_vm4 = vcmp.ne.f32.partialorder %v4563_v59, %v4563_v59 }
 0x491   : > { %v3619_v30 = vpop.eup %3618  ;;  %v1955_v28 = vadd.f32 1.0, %v3617_v15  ;;  %3275 = vmatprep.subr.bf16.mxu1 %v2017_v0  ;;  %v1952_v34 = vand.u32 2147483647, %v3611_v57  ;;  %v1958_v14 = vmul.f32 -0.5, %v3617_v15  ;;  %v1722_v63 = vmax.f32 %v4612_v58, 0.0 }
 0x492   : > { %v3621_v23 = vpop.eup %3620  ;;  %v1936_v19 = vsel %vm1935_vm1, %v1933_v55, %v1930_v61  ;;  %v1675_v26 = vadd.f32 1.0, %v3619_v30  ;;  %v1951_v40 = vmul.f32 %v3611_v57, %v1950_v8  ;;  %v1961_v25 = vand.u32 2147483647, %v3617_v15 }
 0x493   : > { %v1976_v10 = vadd.f32 %v1936_v19, %v1720_v7  ;;  %v1939_v3 = vmul.f32 0.6931472, %v3621_v23  ;;  %3628 = vlog2.f32 %v1955_v28  ;;  %3276 = vmatpush3.bf16.msra.mxu1 %v2017_v0  ;;  %vm1953_vm5 = vcmp.lt.f32.partialorder %v1952_v34, 0.0004427343  ;;  %v2098_v0 = vld [vmem:[#allocation3] sm:$0xff]  ;;  %v2101_v7 = vld [vmem:[#allocation3 + $0x18] sm:$0xff] }
 0x494   : > { %3630 = vrcp.f32 %v1674_v6  ;;  %v3623_v49 = vpop.eup %3622  ;;  %v1959_v20 = vadd.f32 1.0, %v1958_v14  ;;  %vm1738_vm6 = vcmp.ne.f32.partialorder %v4612_v58, %v4612_v58  ;;  %v1723_v41 = vmax.f32 %v4649_v52, 0.0  ;;  %v2100_v6 = vld [vmem:[#allocation3 + $0x10] sm:$0xff]  ;;  %v2099_v23 = vld [vmem:[#allocation3 + $0x8] sm:$0xff] }
 0x495   : > { %v1945_v44 = vsel %vm1944_vm3, %v1942_v43, %v1939_v3  ;;  %v1992_v53 = vsel %vm1736_vm2, %v4543_v32, %v1976_v10  ;;  %v3625_v62 = vpop.eup %3624  ;;  %3632 = vrcp.f32 %v1675_v26  ;;  %vm1962_vm7 = vcmp.lt.f32.partialorder %v1961_v25, 0.0004427343 }
 0x496   : > { %v1977_v2 = vadd.f32 %v1945_v44, %v1721_v4  ;;  %v2008_v38 = vmul.f32 %v3623_v49, %v1992_v53  ;;  %vm1739_vm8 = vcmp.ne.f32.partialorder %v4649_v52, %v4649_v52  ;;  %v2023_v57 = vadd.s32 16, %v4286_v36  ;;  %v2104_v49 = vld [vmem:[#allocation3 + $0x30] sm:$0xff]  ;;  %v2102_v44 = vld [vmem:[#allocation3 + $0x20] sm:$0xff] }
 0x497   : > { %v2024_v31 = vadd.s32 24, %v4286_v36  ;;  %v2025_v17 = vadd.s32 32, %v4286_v36  ;;  %v2027_v12 = vadd.s32 48, %v4286_v36  ;;  %v2028_v29 = vadd.s32 56, %v4286_v36 }
 0x498   : > { %v3627_v27 = vpop.eup %3626  ;;  %v1993_v18 = vsel %vm1737_vm4, %v4563_v59, %v1977_v2  ;;  %v1960_v59 = vmul.f32 %v3617_v15, %v1959_v20  ;;  %vm2044_vm9 = vcmp.eq.s32.totalorder %v3634_v24, %v2023_v57  ;;  %v2030_v9 = vadd.s32 72, %v4286_v36  ;;  %v2103_v2 = vld [vmem:[#allocation3 + $0x28] sm:$0xff] }
 0x499   : > { %v1948_v37 = vmul.f32 0.6931472, %v3627_v27  ;;  %v2009_v50 = vmul.f32 %v3625_v62, %v1993_v18  ;;  %vm2045_vm10 = vcmp.eq.s32.totalorder %v3634_v24, %v2024_v31  ;;  %vm2046_vm11 = vcmp.eq.s32.totalorder %v3634_v24, %v2025_v17  ;;  %v2108_v18 = vld [vmem:[#allocation3 + $0x50] sm:$0xff] }
 0x49a   : > { %vm3006_vm13 = vmpackc.low %vm2045_vm10, %vm2044_vm9  ;;  %vm2048_vm15 = vcmp.eq.s32.totalorder %v3634_v24, %v2027_v12  ;;  %vm2049_vm1 = vcmp.eq.s32.totalorder %v3634_v24, %v2028_v29  ;;  %vm2051_vm3 = vcmp.eq.s32.totalorder %v3634_v24, %v2030_v9  ;;  %v2031_v13 = vadd.s32 80, %v4286_v36  ;;  %v2249_v29 = vld [vmem:[#allocation2 + $0x10] sm:$0xff] (!%p3020_p0) }
 0x49b   : > { %v1954_v32 = vsel %vm1953_vm5, %v1951_v40, %v1948_v37  ;;  %v2018_v33 = vpack.c.bf16 %v2009_v50, %v2008_v38  ;;  %vm3010_vm4 = vmpackc.low %vm2049_vm1, %vm2048_vm15  ;;  %v2032_v51 = vadd.s32 88, %v4286_v36  ;;  %v2033_v56 = vadd.s32 96, %v4286_v36  ;;  %v2106_v37 = vld [vmem:[#allocation3 + $0x40] sm:$0xff]  ;;  %v2109_v50 = vld [vmem:[#allocation3 + $0x58] sm:$0xff] }
 0x49c   : > { %v1978_v21 = vadd.f32 %v1954_v32, %v1722_v63  ;;  %v2034_v15 = vadd.s32 104, %v4286_v36  ;;  %v2035_v61 = vadd.s32 112, %v4286_v36  ;;  %v2036_v55 = vadd.s32 120, %v4286_v36  ;;  %v2107_v32 = vld [vmem:[#allocation3 + $0x48] sm:$0xff] }
 0x49d   : > { %v3629_v60 = vpop.eup %3628  ;;  %3277 = vmatprep.subr.bf16.mxu1 %v2018_v33 }
 0x49e   : > { %v3631_v39 = vpop.eup %3630  ;;  %v1957_v5 = vmul.f32 0.6931472, %v3629_v60  ;;  %3278 = vmatpush3.bf16.msra.mxu1 %v2018_v33  ;;  %v1994_v54 = vsel %vm1738_vm6, %v4612_v58, %v1978_v21  ;;  %v2026_v58 = vadd.s32 40, %v4286_v36  ;;  %vm2052_vm6 = vcmp.eq.s32.totalorder %v3634_v24, %v2031_v13 }
 0x49f   : > { %v2010_v45 = vmul.f32 %v3631_v39, %v1994_v54  ;;  %v3633_v35 = vpop.eup %3632  ;;  %vm2055_vm9 = vcmp.eq.s32.totalorder %v3634_v24, %v2034_v15  ;;  %v2251_v15 = vld [vmem:[#allocation2 + $0x20] sm:$0xff] (!%p3020_p0) }
 0x4a0   : > { %v1963_v48 = vsel %vm1962_vm7, %v1960_v59, %v1957_v5  ;;  %vm2047_vm12 = vcmp.eq.s32.totalorder %v3634_v24, %v2026_v58  ;;  %vm2053_vm7 = vcmp.eq.s32.totalorder %v3634_v24, %v2032_v51  ;;  %v2112_v5 = vld [vmem:[#allocation3 + $0x70] sm:$0xff]  ;;  %v2110_v59 = vld [vmem:[#allocation3 + $0x60] sm:$0xff]  ;;  %v2250_v51 = vld [vmem:[#allocation2 + $0x18] sm:$0xff] (!%p3020_p0) }
 0x4a1   : > { %v1979_v11 = vadd.f32 %v1963_v48, %v1723_v41  ;;  %vm3008_vm14 = vmpackc.low %vm2047_vm12, %vm2046_vm11  ;;  %vm2056_vm12 = vcmp.eq.s32.totalorder %v3634_v24, %v2035_v61  ;;  %v2113_v41 = vld [vmem:[#allocation3 + $0x78] sm:$0xff]  ;;  %v2247_v58 = vld [vmem:[#allocation2] sm:$0xff] (!%p3020_p0) }
 0x4a2   : > { %vm3014_vm10 = vmpackc.low %vm2053_vm7, %vm2052_vm6 }
 0x4a3   : > { %v1995_v42 = vsel %vm1739_vm8, %v4649_v52, %v1979_v11  ;;  %v2029_v52 = vadd.s32 64, %v4286_v36  ;;  %vm2054_vm8 = vcmp.eq.s32.totalorder %v3634_v24, %v2033_v56  ;;  %v2111_v11 = vld [vmem:[#allocation3 + $0x68] sm:$0xff] }
 0x4a4   : > { %v2011_v46 = vmul.f32 %v3633_v35, %v1995_v42  ;;  %vm3016_vm11 = vmpackc.low %vm2055_vm9, %vm2054_vm8 }
 0x4a5   : > { %vm2050_vm2 = vcmp.eq.s32.totalorder %v3634_v24, %v2029_v52 }
 0x4a6   : > { %v2019_v16 = vpack.c.bf16 %v2011_v46, %v2010_v45  ;;  %vm3012_vm5 = vmpackc.low %vm2051_vm3, %vm2050_vm2 }
 0x4a8   : > { %3279 = vmatprep.subr.bf16.mxu1 %v2019_v16 }
 0x4a9   : > { %3280 = vmatpush3.bf16.msra.mxu1 %v2019_v16  ;;  %v2248_v16 = vld [vmem:[#allocation2 + $0x8] sm:$0xff] (!%p3020_p0) }
 0x4ac   : > { %3282 = vmatmul.mubr.msk.bf16.vlgmr.msra.gmra.mrb[16].mxu1 %vm3006_vm13, %v3823_v22  ;;  %vm2057_vm13 = vcmp.eq.s32.totalorder %v3634_v24, %v2036_v55 }
 0x4ad   : > { %3285 = vmatprep.mubr.msk.bf16.mxu1 %vm3008_vm14, %v3823_v22  ;;  %vm3018_vm14 = vmpackc.low %vm2057_vm13, %vm2056_vm12 }
 0x4b4   : > { %3286 = vmatmul.mubr.msk.bf16.gmra.mrb[20].mxu1 %vm3010_vm4, %v3823_v22 }
 0x4b5   : > { %3289 = vmatprep.mubr.msk.bf16.mxu1 %vm3012_vm5, %v3823_v22 }
 0x4bc   : > { %3290 = vmatmul.mubr.msk.bf16.gmra.mrb[24].mxu1 %vm3014_vm10, %v3823_v22 }
 0x4bd   : > { %3293 = vmatprep.mubr.msk.bf16.mxu1 %vm3016_vm11, %v3823_v22 }
 0x4c4   : > { %3294 = vmatmul.mubr.msk.bf16.gmra.mrb[28].mxu1 %vm3018_vm14, %v3823_v22  ;;  %v2105_v22 = vld [vmem:[#allocation3 + $0x38] sm:$0xff] }
 0x57f   : > { %v3283_v30 = vpop.f32.mrb[16].mxu1 }
 0x580   : > { %v2213_v47 = vadd.f32 %v3283_v30, %v2100_v6  ;;  %v2148_v28 = vpop.f32.mrb[17].mxu1 }
 0x581   : > { %v2211_v19 = vadd.f32 %v2148_v28, %v2098_v0  ;;  %v3284_v10 = vpop.f32.mrb[18].mxu1  ;;  %v2252_v0 = vld [vmem:[#allocation2 + $0x28] sm:$0xff] (!%p3020_p0) }
 0x582   : > { %2229 = vst [vmem:[#allocation3 + $0x10] sm:$0xff] %v2213_v47  ;;  %v2214_v3 = vadd.f32 %v3284_v10, %v2101_v7  ;;  %v2151_v43 = vpop.f32.mrb[19].mxu1 }
 0x583   : > { %2227 = vst [vmem:[#allocation3] sm:$0xff] %v2211_v19  ;;  %v2212_v4 = vadd.f32 %v2151_v43, %v2099_v23  ;;  %v2253_v19 = vld [vmem:[#allocation2 + $0x30] sm:$0xff] (!%p3020_p0) }
 0x584   : > { %2230 = vst [vmem:[#allocation3 + $0x18] sm:$0xff] %v2214_v3  ;;  %v2254_v3 = vld [vmem:[#allocation2 + $0x38] sm:$0xff] (!%p3020_p0) }
 0x585   : > { %2228 = vst [vmem:[#allocation3 + $0x8] sm:$0xff] %v2212_v4 }
 0x587   : > { %v3287_v8 = vpop.f32.mrb[20].mxu1 }
 0x588   : > { %v2217_v26 = vadd.f32 %v3287_v8, %v2104_v49  ;;  %v2164_v53 = vpop.f32.mrb[21].mxu1  ;;  %v2255_v8 = vld [vmem:[#allocation2 + $0x40] sm:$0xff] (!%p3020_p0) }
 0x589   : > { %v2215_v34 = vadd.f32 %v2164_v53, %v2102_v44  ;;  %v3288_v14 = vpop.f32.mrb[22].mxu1  ;;  %v2265_v52 = vld [vmem:[#allocation3 + $0x10] sm:$0xff] (!%p3020_p0) }
 0x58a   : > { %2233 = vst [vmem:[#allocation3 + $0x30] sm:$0xff] %v2217_v26  ;;  %v2218_v38 = vadd.f32 %v3288_v14, %v2105_v22  ;;  %v2167_v62 = vpop.f32.mrb[23].mxu1  ;;  %v2263_v46 = vld [vmem:[#allocation3] sm:$0xff] (!%p3020_p0)  ;;  %v4767_v13 = vadd.f32 (!%p3020_p0), %v2265_v52, %v2249_v29  ;;  %v2256_v14 = vld [vmem:[#allocation2 + $0x48] sm:$0xff] (!%p3020_p0) }
 0x58b   : > { %2231 = vst [vmem:[#allocation3 + $0x20] sm:$0xff] %v2215_v34  ;;  %v2216_v27 = vadd.f32 %v2167_v62, %v2103_v2  ;;  %v4763_v24 = vadd.f32 (!%p3020_p0), %v2263_v46, %v2247_v58  ;;  %v2266_v56 = vld [vmem:[#allocation3 + $0x18] sm:$0xff] (!%p3020_p0) }
 0x58c   : > { %2234 = vst [vmem:[#allocation3 + $0x38] sm:$0xff] %v2218_v38  ;;  %v2264_v12 = vld [vmem:[#allocation3 + $0x8] sm:$0xff] (!%p3020_p0)  ;;  %v4770_v55 = vadd.f32 (!%p3020_p0), %v2266_v56, %v2250_v51  ;;  %v2297_v47 = vmax.f32 (!%p3020_p0), %v4767_v13, 0.0  ;;  %v2262_v58 = vld [vmem:[#allocation2 + $0x78] sm:$0xff] (!%p3020_p0) }
 0x58d   : > { %2232 = vst [vmem:[#allocation3 + $0x28] sm:$0xff] %v2216_v27  ;;  %v4765_v9 = vadd.f32 (!%p3020_p0), %v2264_v12, %v2248_v16  ;;  %v2295_v61 = vmax.f32 (!%p3020_p0), %v4763_v24, 0.0 }
 0x58e   : > { %v2298_v4 = vmax.f32 (!%p3020_p0), %v4770_v55, 0.0  ;;  %v2315_v53 = vsel (!%p3020_p0), %vm610_vm0, %v2297_v47, 0.0 }
 0x58f   : > { %v3291_v40 = vpop.f32.mrb[24].mxu1  ;;  %v2296_v7 = vmax.f32 (!%p3020_p0), %v4765_v9, 0.0  ;;  %v2313_v43 = vsel (!%p3020_p0), %vm610_vm0, %v2295_v61, 0.0  ;;  %2331 = vst [vmem:[#allocation2 + $0x10] sm:$0xff] (!%p3020_p0), %v2315_v53 }
 0x590   : > { %v2221_v63 = vadd.f32 %v3291_v40, %v2108_v18  ;;  %v2180_v20 = vpop.f32.mrb[25].mxu1  ;;  %2329 = vst [vmem:[#allocation2] sm:$0xff] (!%p3020_p0), %v2313_v43  ;;  %v2316_v62 = vsel (!%p3020_p0), %vm610_vm0, %v2298_v4, 0.0  ;;  %v2257_v40 = vld [vmem:[#allocation2 + $0x50] sm:$0xff] (!%p3020_p0) }
 0x591   : > { %v2219_v25 = vadd.f32 %v2180_v20, %v2106_v37  ;;  %v3292_v33 = vpop.f32.mrb[26].mxu1  ;;  %v2269_v10 = vld [vmem:[#allocation3 + $0x30] sm:$0xff] (!%p3020_p0)  ;;  %v2314_v26 = vsel (!%p3020_p0), %vm610_vm0, %v2296_v7, 0.0  ;;  %2332 = vst [vmem:[#allocation2 + $0x18] sm:$0xff] (!%p3020_p0), %v2316_v62 }
 0x592   : > { %2237 = vst [vmem:[#allocation3 + $0x50] sm:$0xff] %v2221_v63  ;;  %v2222_v21 = vadd.f32 %v3292_v33, %v2109_v50  ;;  %v2183_v60 = vpop.f32.mrb[27].mxu1  ;;  %v2267_v6 = vld [vmem:[#allocation3 + $0x20] sm:$0xff] (!%p3020_p0)  ;;  %v4783_v49 = vadd.f32 (!%p3020_p0), %v2269_v10, %v2253_v19  ;;  %2330 = vst [vmem:[#allocation2 + $0x8] sm:$0xff] (!%p3020_p0), %v2314_v26  ;;  %v2258_v63 = vld [vmem:[#allocation2 + $0x58] sm:$0xff] (!%p3020_p0) }
 0x593   : > { %2235 = vst [vmem:[#allocation3 + $0x40] sm:$0xff] %v2219_v25  ;;  %v2220_v39 = vadd.f32 %v2183_v60, %v2107_v32  ;;  %v4774_v28 = vadd.f32 (!%p3020_p0), %v2267_v6, %v2251_v15  ;;  %v2270_v44 = vld [vmem:[#allocation3 + $0x38] sm:$0xff] (!%p3020_p0)  ;;  %v2259_v60 = vld [vmem:[#allocation2 + $0x60] sm:$0xff] (!%p3020_p0) }
 0x594   : > { %2238 = vst [vmem:[#allocation3 + $0x58] sm:$0xff] %v2222_v21  ;;  %v2268_v30 = vld [vmem:[#allocation3 + $0x28] sm:$0xff] (!%p3020_p0)  ;;  %v2301_v27 = vmax.f32 (!%p3020_p0), %v4783_v49, 0.0  ;;  %v4800_v18 = vadd.f32 (!%p3020_p0), %v2270_v44, %v2254_v3 }
 0x595   : > { %2236 = vst [vmem:[#allocation3 + $0x48] sm:$0xff] %v2220_v39  ;;  %v4776_v23 = vadd.f32 (!%p3020_p0), %v2268_v30, %v2252_v0  ;;  %v2299_v2 = vmax.f32 (!%p3020_p0), %v4774_v28, 0.0 }
 0x597   : > { %v3295_v54 = vpop.f32.mrb[28].mxu1  ;;  %2246 = sbr.rel (%p3020_p0) target bundleno = 2152 (0x868), region = 100  ;;  %v2300_v34 = vmax.f32 (!%p3020_p0), %v4776_v23, 0.0  ;;  %v2317_v20 = vsel (!%p3020_p0), %vm610_vm0, %v2299_v2, 0.0 }
 0x598   : > { %v2225_v45 = vadd.f32 %v3295_v54, %v2112_v5  ;;  %v2196_v48 = vpop.f32.mrb[29].mxu1  ;;  %2333 = vst [vmem:[#allocation2 + $0x20] sm:$0xff] (!%p3020_p0), %v2317_v20  ;;  %v2319_v5 = vsel (!%p3020_p0), %vm610_vm0, %v2301_v27, 0.0 }
 0x599   : > { %v2223_v57 = vadd.f32 %v2196_v48, %v2110_v59  ;;  %v3296_v31 = vpop.f32.mrb[30].mxu1  ;;  %v2273_v50 = vld [vmem:[#allocation3 + $0x50] sm:$0xff] (!%p3020_p0)  ;;  %v2318_v32 = vsel (!%p3020_p0), %vm610_vm0, %v2300_v34, 0.0  ;;  %v2302_v59 = vmax.f32 (!%p3020_p0), %v4800_v18, 0.0  ;;  %2335 = vst [vmem:[#allocation2 + $0x30] sm:$0xff] (!%p3020_p0), %v2319_v5 }
 0x59a   : > { %2241 = vst [vmem:[#allocation3 + $0x70] sm:$0xff] %v2225_v45  ;;  %v2226_v35 = vadd.f32 %v3296_v31, %v2113_v41  ;;  %v2199_v42 = vpop.f32.mrb[31].mxu1  ;;  %v2271_v22 = vld [vmem:[#allocation3 + $0x40] sm:$0xff] (!%p3020_p0)  ;;  %v4814_v33 = vadd.f32 (!%p3020_p0), %v2273_v50, %v2257_v40  ;;  %2334 = vst [vmem:[#allocation2 + $0x28] sm:$0xff] (!%p3020_p0), %v2318_v32  ;;  %v2260_v45 = vld [vmem:[#allocation2 + $0x68] sm:$0xff] (!%p3020_p0) }
 0x59b   : > { %2239 = vst [vmem:[#allocation3 + $0x60] sm:$0xff] %v2223_v57  ;;  %v2224_v17 = vadd.f32 %v2199_v42, %v2111_v11  ;;  %v4802_v37 = vadd.f32 (!%p3020_p0), %v2271_v22, %v2255_v8  ;;  %v2274_v21 = vld [vmem:[#allocation3 + $0x58] sm:$0xff] (!%p3020_p0)  ;;  %v2261_v11 = vld [vmem:[#allocation2 + $0x70] sm:$0xff] (!%p3020_p0)  ;;  %v2320_v16 = vsel (!%p3020_p0), %vm610_vm0, %v2302_v59, 0.0 }
 0x59c   : > { %2242 = vst [vmem:[#allocation3 + $0x78] sm:$0xff] %v2226_v35  ;;  %v2272_v38 = vld [vmem:[#allocation3 + $0x48] sm:$0xff] (!%p3020_p0)  ;;  %v4822_v41 = vadd.f32 (!%p3020_p0), %v2274_v21, %v2258_v63  ;;  %v2305_v31 = vmax.f32 (!%p3020_p0), %v4814_v33, 0.0  ;;  %2336 = vst [vmem:[#allocation2 + $0x38] sm:$0xff] (!%p3020_p0), %v2320_v16 }
 0x59d   : > { %2240 = vst [vmem:[#allocation3 + $0x68] sm:$0xff] %v2224_v17  ;;  %v4812_v25 = vadd.f32 (!%p3020_p0), %v2272_v38, %v2256_v14  ;;  %v2303_v54 = vmax.f32 (!%p3020_p0), %v4802_v37, 0.0 }
 0x59e   : > { %v2306_v29 = vmax.f32 %v4822_v41, 0.0  ;;  %v2323_v56 = vsel %vm610_vm0, %v2305_v31, 0.0  ;;  %v3635_v22 = vld [vmem:[#allocation7] sm:$0xff] (!%p3021_p1)   ;;  %v3636_v26 = vld [vmem:[#allocation7 + $0x8] sm:$0xff] (!%p3021_p1)   ;;  %v3825_v53 = vmov (!%p3021_p1), 0.0   ;;  %v3637_v14 = vld [vmem:[#allocation7 + $0x10] sm:$0xff] (!%p3021_p1)   ;;  %v3032_v38 = vpack.c.bf16 (!%p3021_p1), %v2296_v7, %v2295_v61 }
 0x59f   : > { %v2304_v57 = vmax.f32 %v4812_v25, 0.0  ;;  %v2321_v12 = vsel %vm610_vm0, %v2303_v54, 0.0  ;;  %2339 = vst [vmem:[#allocation2 + $0x50] sm:$0xff] %v2323_v56  ;;  %3297 = vmatprep.subr.bf16.mxu0 (!%p3021_p1), %v3635_v22  ;;  %3329 = vmatprep.subr.bf16.mxu1 (!%p3021_p1), %v3825_v53  ;;  %v3638_v62 = vld [vmem:[#allocation7 + $0x18] sm:$0xff] (!%p3021_p1)   ;;  %vm4873_vm15 = vmpackc.low (!%p3021_p1), %vm610_vm0, %vm610_vm0  ;;  %s5071_s21 = sld [smem:[#allocation16_spill]] (!%p3021_p1)  ;;  %v3639_v24 = vld [vmem:[#allocation7 + $0x20] sm:$0xff] (!%p3021_p1)   ;;  %v3038_v63 = vpack.c.bf16 (!%p3021_p1), %v2300_v34, %v2299_v2  ;;  %v3041_v13 = vpack.c.bf16 (!%p3021_p1), %v2302_v59, %v2301_v27 }
 0x5a0   : > { %2337 = vst [vmem:[#allocation2 + $0x40] sm:$0xff] %v2321_v12  ;;  %v2324_v0 = vsel %vm610_vm0, %v2306_v29, 0.0  ;;  %3298 = vmatpush3.bf16.msra.mxu0 (!%p3021_p1), %v3635_v22  ;;  %3313 = vmatprep.mubr.msk.bf16.mxu0 (!%p3021_p1), %vm4873_vm15, %v3032_v38  ;;  %v3640_v1 = vld [vmem:[#allocation7 + $0x28] sm:$0xff] (!%p3021_p1)   ;;  %v3641_v61 = vld [vmem:[#allocation7 + $0x30] sm:$0xff] (!%p3021_p1)   ;;  %v3642_v7 = vld [vmem:[#allocation7 + $0x38] sm:$0xff] (!%p3021_p1)   ;;  %s5072_s23 = sld [smem:[#allocation19_spill]] (!%p3021_p1) }
 0x5a1   : > { %v2277_v17 = vld [vmem:[#allocation3 + $0x70] sm:$0xff]  ;;  %v2322_v51 = vsel %vm610_vm0, %v2304_v57, 0.0  ;;  %2340 = vst [vmem:[#allocation2 + $0x58] sm:$0xff] %v2324_v0  ;;  %3299 = vmatprep.subr.bf16.mxu0 (!%p3021_p1), %v3636_v26  ;;  %v3044_v55 = vpack.c.bf16 (!%p3021_p1), %v2304_v57, %v2303_v54  ;;  %v3644_v49 = vld [vmem:[#allocation9 + $0x8] sm:$0xff] (!%p3021_p1)   ;;  %v3646_v34 = vld [vmem:[#allocation9 + $0x18] sm:$0xff] (!%p3021_p1)   ;;  %s5073_s13 = sld [smem:[#allocation20_spill]] (!%p3021_p1) }
 0x5a2   : > { %v2275_v39 = vld [vmem:[#allocation3 + $0x60] sm:$0xff]  ;;  %v4839_v52 = vadd.f32 %v2277_v17, %v2261_v11  ;;  %2338 = vst [vmem:[#allocation2 + $0x48] sm:$0xff] %v2322_v51  ;;  %v3645_v2 = vld [vmem:[#allocation9 + $0x10] sm:$0xff] (!%p3021_p1)   ;;  %v3648_v18 = vld [vmem:[#allocation9 + $0x28] sm:$0xff] (!%p3021_p1)  }
 0x5a3   : > { %v4826_v35 = vadd.f32 %v2275_v39, %v2259_v60  ;;  %v2278_v46 = vld [vmem:[#allocation3 + $0x78] sm:$0xff]  ;;  %v3647_v27 = vld [vmem:[#allocation9 + $0x20] sm:$0xff] (!%p3021_p1)   ;;  %v3649_v37 = vld [vmem:[#allocation9 + $0x30] sm:$0xff] (!%p3021_p1)  }
 0x5a4   : > { %v2276_v48 = vld [vmem:[#allocation3 + $0x68] sm:$0xff]  ;;  %v2309_v30 = vmax.f32 %v4839_v52, 0.0  ;;  %v2294_v19 = vadd.f32 %v2278_v46, %v2262_v58  ;;  %2348 = sbr.rel (%p3021_p1) target bundleno = 2152 (0x868), region = 104  ;;  %3300 = vmatpush3.bf16.msra.mxu0 (!%p3021_p1), %v3636_v26  ;;  %v3650_v20 = vld [vmem:[#allocation9 + $0x38] sm:$0xff] (!%p3021_p1)  }
 0x5a5   : > { %v4828_v42 = vadd.f32 %v2276_v48, %v2260_v45  ;;  %v2307_v15 = vmax.f32 %v4826_v35, 0.0  ;;  %3301 = vmatprep.subr.bf16.mxu0 (!%p3021_p1), %v3637_v14  ;;  %v3055_v50 = vld [vmem:[%s5071_s21] ss:$0 sm:$0xff] (!%p3021_p1) }
 0x5a6   : > { %v2327_v43 = vsel %vm610_vm0, %v2309_v30, 0.0  ;;  %v2310_v44 = vmax.f32 %v2294_v19, 0.0  ;;  %vm2546_vm1 = vcmp.eq.s32.totalorder (!%p3021_p1), %v3055_v50, %v4286_v36  ;;  %v3035_v36 = vpack.c.bf16 (!%p3021_p1), %v2298_v4, %v2297_v47  ;;  %v3643_v4 = vld [vmem:[#allocation9] sm:$0xff] (!%p3021_p1)  }
 0x5a7   : > { %v2308_v6 = vmax.f32 %v4828_v42, 0.0  ;;  %v2325_v10 = vsel %vm610_vm0, %v2307_v15, 0.0  ;;  %2343 = vst [vmem:[#allocation2 + $0x70] sm:$0xff] %v2327_v43  ;;  %v4884_v9 = vsel (!%p3021_p1), %vm2546_vm1, 1.0, %v3825_v53  ;;  %v3047_v47 = vpack.c.bf16 (!%p3021_p1), %v2306_v29, %v2305_v31  ;;  %v4934_v32 = vld [vmem:[%s5072_s23] ss:$0 sm:$0xff] (!%p3021_p1) }
 0x5a8   : > { %2341 = vst [vmem:[#allocation2 + $0x60] sm:$0xff] %v2325_v10  ;;  %v2328_v8 = vsel %vm610_vm0, %v2310_v44, 0.0  ;;  %3302 = vmatpush3.bf16.msra.mxu0 (!%p3021_p1), %v3637_v14  ;;  %2549 = vadd.xlane.f32.xlu0 (!%p3021_p1), %v4884_v9  ;;  %v3053_v23 = vpack.c.bf16 (!%p3021_p1), %v2310_v44, %v2309_v30 }
 0x5a9   : > { %v2326_v3 = vsel %vm610_vm0, %v2308_v6, 0.0  ;;  %2344 = vst [vmem:[#allocation2 + $0x78] sm:$0xff] %v2328_v8  ;;  %3303 = vmatprep.subr.bf16.mxu0 (!%p3021_p1), %v3638_v62  ;;  %v3050_v28 = vpack.c.bf16 (!%p3021_p1), %v2308_v6, %v2307_v15  ;;  %vm3826_vm0 = vmmov (!%p3021_p1), 0  }
 0x5aa   : > { %2342 = vst [vmem:[#allocation2 + $0x68] sm:$0xff] %v2326_v3  ;;  %3345 = vmatprep.mubr.msk.bf16.mxu1 (!%p3021_p1), %vm3826_vm0, %v3825_v53 }
 0x5ac   : > { %3304 = vmatpush3.bf16.msra.mxu0 %v3638_v62 }
 0x5ad   : > { %3305 = vmatprep.subr.bf16.mxu0 %v3639_v24 }
 0x5b0   : > { %3306 = vmatpush3.bf16.msra.mxu0 %v3639_v24 }
 0x5b1   : > { %3307 = vmatprep.subr.bf16.mxu0 %v3640_v1 }
 0x5b4   : > { %3308 = vmatpush3.bf16.msra.mxu0 %v3640_v1 }
 0x5b5   : > { %3309 = vmatprep.subr.bf16.mxu0 %v3641_v61 }
 0x5b8   : > { %3310 = vmatpush3.bf16.msra.mxu0 %v3641_v61 }
 0x5b9   : > { %3311 = vmatprep.subr.bf16.mxu0 %v3642_v7 }
 0x5bc   : > { %3312 = vmatpush3.bf16.msra.mxu0 %v3642_v7 }
 0x5bd   : > { %3349 = vmatprep.subr.bf16.mxu0 %v3825_v53 }
 0x5bf   : > { %3314 = vmatmul.mubr.msk.bf16.vlgmr.msra.gmra.mrb[0].mxu0 %vm4873_vm15, %v3035_v36 }
 0x5c0   : > { %3317 = vmatprep.mubr.msk.bf16.mxu0 %vm4873_vm15, %v3038_v63  ;;  %3350 = vmatpush3.bf16.msra.mxu0 %v3643_v4 }
 0x5c1   : > { %3351 = vmatprep.subr.bf16.mxu0 %v3825_v53 }
 0x5c4   : > { %3352 = vmatpush3.bf16.msra.mxu0 %v3644_v49 }
 0x5c5   : > { %3353 = vmatprep.subr.bf16.mxu0 %v3825_v53 }
 0x5c7   : > { %3318 = vmatmul.mubr.msk.bf16.gmra.mrb[4].mxu0 %vm4873_vm15, %v3041_v13 }
 0x5c8   : > { %3321 = vmatprep.mubr.msk.bf16.mxu0 %vm4873_vm15, %v3044_v55  ;;  %3354 = vmatpush3.bf16.msra.mxu0 %v3645_v2 }
 0x5c9   : > { %3355 = vmatprep.subr.bf16.mxu0 %v3825_v53 }
 0x5cc   : > { %3356 = vmatpush3.bf16.msra.mxu0 %v3646_v34 }
 0x5cd   : > { %3357 = vmatprep.subr.bf16.mxu0 %v3825_v53 }
 0x5cf   : > { %3322 = vmatmul.mubr.msk.bf16.gmra.mrb[8].mxu0 %vm4873_vm15, %v3047_v47 }
 0x5d0   : > { %3325 = vmatprep.mubr.msk.bf16.mxu0 %vm4873_vm15, %v3050_v28  ;;  %3358 = vmatpush3.bf16.msra.mxu0 %v3647_v27 }
 0x5d1   : > { %3359 = vmatprep.subr.bf16.mxu0 %v3825_v53 }
 0x5d4   : > { %3360 = vmatpush3.bf16.msra.mxu0 %v3648_v18 }
 0x5d5   : > { %3361 = vmatprep.subr.bf16.mxu0 %v3825_v53 }
 0x5d7   : > { %3326 = vmatmul.mubr.msk.bf16.gmra.mrb[12].mxu0 %vm4873_vm15, %v3053_v23 }
 0x5d8   : > { %3365 = vmatprep.mubr.msk.bf16.mxu0 %vm3826_vm0, %v3825_v53  ;;  %3362 = vmatpush3.bf16.msra.mxu0 %v3649_v37 }
 0x5d9   : > { %3363 = vmatprep.subr.bf16.mxu0 %v3825_v53 }
 0x5dc   : > { %3364 = vmatpush3.bf16.msra.mxu0 %v3650_v20 }
 0x635   : > { %v2550_v56 = vpop.xlane.xlu0 %2549 }
 0x636   : > { %v2551_v10 = vmax.f32 %v2550_v56, 1.0 }
 0x638   : > { %3651 = vrcp.f32 %v2551_v10 }
 0x642   : > { %v3652_v49 = vpop.eup %3651 }
 0x643   : > { %v2553_v37 = vmul.f32 %v3652_v49, %v4884_v9 }
 0x645   : > { %v2554_v20 = vpack.c.bf16 %v2553_v37, %v2553_v37 }
 0x692   : > { %v3315_v25 = vpop.f32.mrb[0].mxu0 }
 0x693   : > { %v2471_v33 = vadd.f32 %v3315_v25, %v4934_v32  ;;  %v2462_v21 = vpop.f32.mrb[1].mxu0 }
 0x694   : > { %v2463_v60 = vadd.f32 %v4934_v32, %v2462_v21  ;;  %v3316_v39 = vpop.f32.mrb[2].mxu0 }
 0x695   : > { %v2474_v5 = vadd.f32 %v3316_v39, %v4934_v32  ;;  %v2465_v59 = vpop.f32.mrb[3].mxu0  ;;  %v2527_v41 = vmax.f32 %v2471_v33, 0.0  ;;  %v3057_v39 = vld [vmem:[%s5073_s13] ss:$0 sm:$0xff] }
 0x696   : > { %v2466_v54 = vadd.f32 %v4934_v32, %v2465_v59  ;;  %v2525_v48 = vmax.f32 %v2463_v60, 0.0 }
 0x697   : > { %v2528_v45 = vmax.f32 %v2474_v5, 0.0 }
 0x698   : > { %v2526_v11 = vmax.f32 %v2466_v54, 0.0 }
 0x699   : > { %v2556_v57 = vpack.c.bf16 %v2528_v45, %v2527_v41 }
 0x69a   : > { %v3319_v31 = vpop.f32.mrb[4].mxu0  ;;  %v2555_v35 = vpack.c.bf16 %v2526_v11, %v2525_v48 }
 0x69b   : > { %v2487_v42 = vadd.f32 %v3319_v31, %v4934_v32  ;;  %v2478_v17 = vpop.f32.mrb[5].mxu0 }
 0x69c   : > { %v2479_v58 = vadd.f32 %v4934_v32, %v2478_v17  ;;  %v3320_v46 = vpop.f32.mrb[6].mxu0  ;;  %3330 = vmatpush3.bf16.msra.mxu1 %v2555_v35 }
 0x69d   : > { %v2490_v16 = vadd.f32 %v3320_v46, %v4934_v32  ;;  %v2481_v12 = vpop.f32.mrb[7].mxu0  ;;  %3331 = vmatprep.subr.bf16.mxu1 %v3825_v53  ;;  %v2531_v52 = vmax.f32 %v2487_v42, 0.0 }
 0x69e   : > { %v2482_v29 = vadd.f32 %v4934_v32, %v2481_v12  ;;  %v2529_v15 = vmax.f32 %v2479_v58, 0.0 }
 0x69f   : > { %v2532_v51 = vmax.f32 %v2490_v16, 0.0 }
 0x6a0   : > { %v2530_v6 = vmax.f32 %v2482_v29, 0.0  ;;  %3332 = vmatpush3.bf16.msra.mxu1 %v2556_v57 }
 0x6a1   : > { %v2558_v0 = vpack.c.bf16 %v2532_v51, %v2531_v52  ;;  %3333 = vmatprep.subr.bf16.mxu1 %v3825_v53 }
 0x6a2   : > { %v2557_v30 = vpack.c.bf16 %v2530_v6, %v2529_v15  ;;  %v3323_v19 = vpop.f32.mrb[8].mxu0 }
 0x6a3   : > { %v2503_v3 = vadd.f32 %v3323_v19, %v4934_v32  ;;  %v2494_v43 = vpop.f32.mrb[9].mxu0 }
 0x6a4   : > { %v2495_v44 = vadd.f32 %v4934_v32, %v2494_v43  ;;  %v3324_v8 = vpop.f32.mrb[10].mxu0  ;;  %3334 = vmatpush3.bf16.msra.mxu1 %v2557_v30 }
 0x6a5   : > { %v2506_v22 = vadd.f32 %v3324_v8, %v4934_v32  ;;  %v2497_v26 = vpop.f32.mrb[11].mxu0  ;;  %3335 = vmatprep.subr.bf16.mxu1 %v3825_v53  ;;  %v2535_v38 = vmax.f32 %v2503_v3, 0.0 }
 0x6a6   : > { %v2498_v14 = vadd.f32 %v4934_v32, %v2497_v26  ;;  %v2533_v40 = vmax.f32 %v2495_v44, 0.0 }
 0x6a7   : > { %v2536_v62 = vmax.f32 %v2506_v22, 0.0 }
 0x6a8   : > { %v2534_v50 = vmax.f32 %v2498_v14, 0.0  ;;  %3336 = vmatpush3.bf16.msra.mxu1 %v2558_v0 }
 0x6a9   : > { %v2560_v24 = vpack.c.bf16 %v2536_v62, %v2535_v38  ;;  %3337 = vmatprep.subr.bf16.mxu1 %v3825_v53 }
 0x6aa   : > { %v2559_v1 = vpack.c.bf16 %v2534_v50, %v2533_v40  ;;  %v3327_v61 = vpop.f32.mrb[12].mxu0 }
 0x6ab   : > { %v2519_v7 = vadd.f32 %v3327_v61, %v4934_v32  ;;  %v2510_v36 = vpop.f32.mrb[13].mxu0 }
 0x6ac   : > { %v2511_v63 = vadd.f32 %v4934_v32, %v2510_v36  ;;  %v3328_v13 = vpop.f32.mrb[14].mxu0  ;;  %3338 = vmatpush3.bf16.msra.mxu1 %v2559_v1 }
 0x6ad   : > { %v2522_v55 = vadd.f32 %v3328_v13, %v4934_v32  ;;  %v2513_v47 = vpop.f32.mrb[15].mxu0  ;;  %3339 = vmatprep.subr.bf16.mxu1 %v3825_v53  ;;  %v2539_v23 = vmax.f32 %v2519_v7, 0.0 }
 0x6ae   : > { %v2514_v28 = vadd.f32 %v4934_v32, %v2513_v47  ;;  %v2537_v2 = vmax.f32 %v2511_v63, 0.0 }
 0x6af   : > { %v2540_v4 = vmax.f32 %v2522_v55, 0.0 }
 0x6b0   : > { %v2538_v34 = vmax.f32 %v2514_v28, 0.0  ;;  %3340 = vmatpush3.bf16.msra.mxu1 %v2560_v24 }
 0x6b1   : > { %v2562_v27 = vpack.c.bf16 %v2540_v4, %v2539_v23  ;;  %3341 = vmatprep.subr.bf16.mxu1 %v3825_v53 }
 0x6b2   : > { %v2561_v18 = vpack.c.bf16 %v2538_v34, %v2537_v2 }
 0x6b4   : > { %3342 = vmatpush3.bf16.msra.mxu1 %v2561_v18 }
 0x6b5   : > { %3343 = vmatprep.subr.bf16.mxu1 %v3825_v53 }
 0x6b8   : > { %3344 = vmatpush3.bf16.msra.mxu1 %v2562_v27 }
 0x6bb   : > { %3346 = vmatmul.mubr.bf16.vlgmr.msra.gmra.mrb[0].mxu1 %v2554_v20 }
 0x78e   : > { %v2597_v25 = vpop.f32.mrb[0].mxu1 }
 0x78f   : > { %v2603_v32 = vpack.c.bf16 %v2597_v25, %v2597_v25  ;;  %v3347_v33 = vpop.f32.mrb[1].mxu1 }
 0x790   : > { %v2600_v21 = vpop.f32.mrb[2].mxu1 }
 0x791   : > { %v3348_v60 = vpop.f32.mrb[3].mxu1  ;;  %3366 = vmatmul.mubr.bf16.vlgmr.msra.gmra.mrb[16].mxu0 %v2603_v32 }
 0x864   : > { %v2709_v5 = vpop.f32.mrb[16].mxu0 }
 0x865   : > { %v2710_v59 = vadd.f32 %v3057_v39, %v2709_v5  ;;  %v3367_v54 = vpop.f32.mrb[17].mxu0 }
 0x866   : > { %v2712_v9 = vpop.f32.mrb[18].mxu0 }
 0x867   : > { %2715 = vst [vmem:[#allocation10] sm:$0xff] %v2710_v59  ;;  %v3368_v41 = vpop.f32.mrb[19].mxu0 }
 0x868 PF: > { %s5074_s10 = sld [smem:[#allocation14_spill]]  ;;  %s3827_s20 = smov [#allocation10]  }
 0x869   : > { %s2723_s19 = sshll.u32 %s3827_s20, 4  ;;  %s2724_s19 = int_to_ptr.vmem [resolvable:$true] %s2723_s19 }
 0x86a   : > { %s3737_s5 = scalar_lea.vmem %s2724_s19, 128  ;;  %p3744_p7 = scmp.lt.s32.totalorder %s2724_s19, %s2724_s19 }
 0x86b   : > { %p3738_p6 = scmp.ne.s32.totalorder %s2724_s19, %s3737_s5  ;;  %p3745_p5 = scmp.lt.s32.totalorder %s3737_s5, %s3737_s5 }
 0x86d   : > { %p3746_p8 = por %p3745_p5, %p3744_p7 }
 0x86e   : > { %s5075_s27 = sadd.s32 4294967295, %s5074_s10  }
 0x86f   : > { %p4965_p4 = scmp.eq.s32.totalorder %s5075_s27, 5 }
 0x871   : > { %p3739_p3 = pnand %p3738_p6, %p4965_p4 }
 0x873   : > { %p3740_p2 = pneg %p3739_p3 }
 0x875   : > { %p3747_p9 = pnand %p3746_p8, %p3740_p2 }
 0x877   : > { %3750 = shalt.err (!%p3747_p9)
}
 0x878   : > { %s5077_s26 = sld [smem:[#allocation21_spill]] }
 0x87e   : > { %s3751_s22 = scalar_lea.hbm %s5077_s26, 128 }
 0x87f   : > { %p3752_p10 = scmp.ne.s32.totalorder %s5077_s26, %s3751_s22  ;;  %p3757_p13 = scmp.lt.u32.totalorder %s3751_s22, %s5077_s26 }
 0x881   : > { %p3753_p11 = pnand %p3752_p10, %p4965_p4 }
 0x883   : > { %p3754_p12 = pneg %p3753_p11 }
 0x885   : > { %p3759_p0 = pnand %p3757_p13, %p3754_p12 }
 0x887   : > { %3762 = shalt.err (!%p3759_p0)
}
 0x888   : > { %3398 = dma.vmem_to_hbm [thread:$0]  (%p4965_p4), %s2724_s19, 128, %s5077_s26, [#allocation6]  }
 0x889   : > { %3792 = dma.done.wait (%p4965_p4), [#allocation6], 128  }
 0x88a   : > { %3794 = vsyncadd (%p4965_p4), [#allocation6], 4294967168 }
 0x88b PF: > { %s5078_s18 = sld [smem:[#allocation14_spill]]  ;;  %s5079_s24 = sld [smem:[#allocation15_spill]] }
 0x88c   : > { %s5080_s29 = smov %s3805_s15  ;;  %s5081_s30 = smov %s3809_s16 }
 0x88d   : > { %s5083_s16 = smov %s5089_s28 }
 0x891   : > { %s27_s17 = sadd.s32 1, %s5078_s18   ;;  %s5082_s15 = smov %s5079_s24 }
 0x892   : > { %p24_p1 = scmp.ge.s32.totalorder %s27_s17, 8  }
 0x894   :  { %26 = sbr.rel (!%p24_p1) target bundleno = 12 (0xc), region = 147 }
 0x89b   :  { %2736 = vsyncpa [#allocation5], 1 }
 0x89c   :  { %2738 = vsyncpa [#allocation5 + $0x1], 1 }
 0x89d   :  { %2739 = vsyncpa [#allocation8], 1 }
 0x89e   :  { %2740 = vsyncpa [#allocation6], 1 }
 0x89f   :  { %2742 = vsyncpa [#allocation6 + $0x1], 1 }

</bundles_post_ra>
